<compile_context>
chip_gen: v5e
topology: v5e:2x2
jax: 0.10.0
libtpu: 0.0.40
codegen_flags: <defaults>
</compile_context>

<pallas_src>
import math

import jax
import jax.numpy as jnp
from jax import lax
from jax.experimental import pallas as pl
from jax.experimental.pallas import tpu as pltpu


# ---------------------------------------------------------------------------
# Pallas kernel: fused [1x1 conv (mask branch) + summed upsampled contributions
# + folded-BN bias + ReLU], computed directly in NCHW (channels x spatial).
# ---------------------------------------------------------------------------

def _fusion_kernel(mask_ref, ups_ref, w_ref, b_ref, o_ref):
    # mask_ref : (1, E,  tn) f32   -- mask_features[b][:, spatial tile]
    # ups_ref  : (1, Eo, tn) bf16  -- sum of upsampled per-map conv outputs
    # w_ref    : (Eo, E)     bf16  -- BN-folded conv weight (mask channel block)
    # b_ref    : (Eo, 1)     f32   -- BN-folded bias
    # o_ref    : (1, Eo, tn)
    x = mask_ref[0].astype(jnp.bfloat16)                      # lane-dense (E, tn)
    acc = jnp.dot(w_ref[...], x, preferred_element_type=jnp.float32)
    acc = acc + ups_ref[0].astype(jnp.float32)
    acc = acc + b_ref[...]                                    # broadcast over lanes
    o_ref[0] = jnp.maximum(acc, 0.0).astype(o_ref.dtype)      # fused ReLU


def fused_conv1x1_bn_relu(mask_cs, ups_cs, w_mask, bias, *, out_dtype=jnp.float32):
    """ReLU(w_mask @ mask_cs[b] + ups_cs[b] + bias[:, None]) for every batch b.

    mask_cs: (B, E, S) f32    ups_cs: (B, Eo, S) bf16
    w_mask : (Eo, E)   bf16   bias  : (Eo,)      f32
    Returns (B, Eo, S) out_dtype.
    """
    B, E, S = mask_cs.shape
    Eo = w_mask.shape[0]

    # Lane-dense spatial tile that divides S -> no wrapper-side padding in the
    # common case; fall back to padding S up to a multiple of 128.
    tn = next((c for c in (512, 256, 128) if S % c == 0), None)
    if tn is None:
        Sp = pl.cdiv(S, 128) * 128
        mask_cs = jnp.pad(mask_cs, ((0, 0), (0, 0), (0, Sp - S)))
        ups_cs = jnp.pad(ups_cs, ((0, 0), (0, 0), (0, Sp - S)))
        tn = 128
    else:
        Sp = S

    bias2d = bias.reshape(Eo, 1).astype(jnp.float32)

    # Double-buffered VMEM footprint of one grid step (already includes the 2x
    # buffering factor); cap at 32 MiB so the request is safe on v7x (64 MiB
    # physical VMEM) as well as v5e/v6e.
    tile_bytes = (2 * (E * tn * 4 + Eo * tn * 2 + Eo * tn * 4)
                  + 2 * (Eo * E * 2 + Eo * 4))
    vmem_limit = int(min(max(tile_bytes + (4 << 20), 16 << 20), 32 << 20))

    out = pl.pallas_call(
        _fusion_kernel,
        out_shape=jax.ShapeDtypeStruct((B, Eo, Sp), out_dtype),
        grid_spec=pltpu.PrefetchScalarGridSpec(
            num_scalar_prefetch=0,
            grid=(B, Sp // tn),
            in_specs=[
                pl.BlockSpec((1, E, tn), lambda b, j: (b, 0, j)),
                pl.BlockSpec((1, Eo, tn), lambda b, j: (b, 0, j)),
                pl.BlockSpec((Eo, E), lambda b, j: (0, 0)),
                pl.BlockSpec((Eo, 1), lambda b, j: (0, 0)),
            ],
            out_specs=pl.BlockSpec((1, Eo, tn), lambda b, j: (b, 0, j)),
        ),
        compiler_params=pltpu.CompilerParams(
            dimension_semantics=("parallel", "parallel"),
            vmem_limit_bytes=vmem_limit,
        ),
    )(mask_cs, ups_cs, w_mask, bias2d)
    return out if Sp == S else out[:, :, :S]


# ---------------------------------------------------------------------------
# Bilinear resize (align_corners=False) as separable interpolation matrices
# ---------------------------------------------------------------------------

def _resize_matrix(n_in: int, n_out: int):
    """(n_out, n_in) bilinear interpolation matrix, PyTorch align_corners=False."""
    if n_in == n_out:
        return jnp.eye(n_out, dtype=jnp.float32)
    scale = n_in / n_out
    dst = jnp.arange(n_out, dtype=jnp.float32)
    src = jnp.maximum((dst + 0.5) * scale - 0.5, 0.0)
    i0 = jnp.clip(jnp.floor(src).astype(jnp.int32), 0, n_in - 1)
    i1 = jnp.minimum(i0 + 1, n_in - 1)
    lam = src - i0.astype(jnp.float32)
    oh0 = jax.nn.one_hot(i0, n_in, dtype=jnp.float32)
    oh1 = jax.nn.one_hot(i1, n_in, dtype=jnp.float32)
    return oh0 * (1.0 - lam)[:, None] + oh1 * lam[:, None]


# ---------------------------------------------------------------------------
# FeatureFusion (Pallas-backed)
# ---------------------------------------------------------------------------

class FeatureFusionPallas:
    def __init__(self, key, embed_dim: int = 256, n_features: int = 4, eps: float = 1e-5):
        self.embed_dim = embed_dim
        self.n_features = n_features
        self.eps = eps

        keys = jax.random.split(key, 6)
        cin = embed_dim * n_features
        bound = 1.0 / math.sqrt(cin)
        # Conv2d(embed_dim*n_features, embed_dim, kernel_size=1)
        self.conv_w = jax.random.uniform(keys[0], (embed_dim, cin, 1, 1),
                                         jnp.float32, -bound, bound)
        self.conv_b = jax.random.uniform(keys[1], (embed_dim,),
                                         jnp.float32, -bound, bound)
        # BatchNorm2d(embed_dim) parameters + running stats (eval mode)
        self.bn_gamma = 1.0 + 0.1 * jax.random.normal(keys[2], (embed_dim,), jnp.float32)
        self.bn_beta = 0.05 * jax.random.normal(keys[3], (embed_dim,), jnp.float32)
        self.bn_mean = 0.1 * jax.random.normal(keys[4], (embed_dim,), jnp.float32)
        self.bn_var = 1.0 + 0.1 * jnp.abs(jax.random.normal(keys[5], (embed_dim,), jnp.float32))

        # Single jitted executable for the whole forward: layout plumbing, tiny
        # per-map convs/interpolations, casts and the pallas_call all dispatch
        # (and fuse) as one unit.
        self._forward = jax.jit(self._forward_impl)

    def _forward_impl(self, maps, mask_features):
        B, C, Ho, Wo = mask_features.shape
        E = self.embed_dim
        assert C == E
        assert len(maps) + 1 == self.n_features

        # Fold eval-mode BatchNorm into the 1x1 conv.
        scale = self.bn_gamma * lax.rsqrt(self.bn_var + self.eps)           # (E,)
        w2d = self.conv_w[:, :, 0, 0] * scale[:, None]                      # (E, E*n)
        bias = (self.conv_b - self.bn_mean) * scale + self.bn_beta          # (E,)
        w_mask = w2d[:, :E]                                                 # mask block

        # Commute the 1x1 conv with the bilinear upsample: convolve each map at
        # its native (tiny) resolution, then interpolate the E-channel result.
        if maps:
            t_list, rx_list = [], []
            for i, m in enumerate(maps):
                assert m.shape[0] == B and m.shape[1] == E
                Hi, Wi = m.shape[-2:]
                w_i = w2d[:, (i + 1) * E:(i + 2) * E]                        # (E, E)
                y = jnp.einsum('oc,bchw->bohw', w_i, m,
                               precision=lax.Precision.HIGHEST)              # (B,E,Hi,Wi)
                Ry = _resize_matrix(Hi, Ho)                                  # (Ho, Hi)
                t_list.append(jnp.einsum('Oh,bchw->bcOw', Ry, y,
                                         precision=lax.Precision.HIGHEST))   # (B,E,Ho,Wi)
                rx_list.append(_resize_matrix(Wi, Wo))                       # (Wo, Wi)
            # One combined column interpolation whose output already equals the
            # SUM of all upsampled per-map conv contributions.
            t_cat = jnp.concatenate(t_list, axis=-1)                         # (B,E,Ho,sumWi)
            rx_cat = jnp.concatenate(rx_list, axis=1)                        # (Wo, sumWi)
            ups = jnp.einsum('Ow,bchw->bchO', rx_cat, t_cat,
                             precision=lax.Precision.HIGHEST)                # (B,E,Ho,Wo)
            ups = ups.astype(jnp.bfloat16)                                   # one bf16 stream
        else:
            ups = jnp.zeros((B, E, Ho, Wo), jnp.bfloat16)

        S = Ho * Wo
        y = fused_conv1x1_bn_relu(
            mask_features.reshape(B, E, S),     # plain NCHW view, no transpose
            ups.reshape(B, E, S),
            w_mask.astype(jnp.bfloat16),
            bias,
        )                                        # (B, E, S) f32
        # TODO(synk): pass out_dtype=jnp.bfloat16 above to halve the writeback
        # stream on v5e if the downstream consumer tolerates bf16.
        return y.reshape(B, E, Ho, Wo)           # already NCHW, no transpose

    def __call__(self, maps, mask_features):
        return self._forward(maps, mask_features)


def reference_forward(mod: FeatureFusionPallas, maps, mask_features):
    """Pure-JAX f32 reference (concat -> conv -> BN -> ReLU; no Pallas, no bf16)."""
    B, E, Ho, Wo = mask_features.shape
    ups = []
    for m in maps:
        Hi, Wi = m.shape[-2:]
        Ry = _resize_matrix(Hi, Ho)
        Rx = _resize_matrix(Wi, Wo)
        t = jnp.einsum('Oh,bchw->bcOw', Ry, m, precision=lax.Precision.HIGHEST)
        ups.append(jnp.einsum('Ow,bchw->bchO', Rx, t, precision=lax.Precision.HIGHEST))
    fused = jnp.concatenate([mask_features] + ups, axis=1)                   # (B,E*n,Ho,Wo)
    w2d = mod.conv_w[:, :, 0, 0]                                             # (E, E*n)
    z = jnp.einsum('ok,bkhw->bohw', w2d, fused,
                   precision=lax.Precision.HIGHEST) + mod.conv_b[None, :, None, None]
    scale = mod.bn_gamma * lax.rsqrt(mod.bn_var + mod.eps)
    z = ((z - mod.bn_mean[None, :, None, None]) * scale[None, :, None, None]
         + mod.bn_beta[None, :, None, None])
    return jnp.maximum(z, 0.0)


# ---------------------------------------------------------------------------
# Main
# ---------------------------------------------------------------------------

if __name__ == "__main__":
    embed_dim = 128      # channels (GEMM K = 128, lane-friendly)
    n_features = 4       # conv in-channels = embed_dim * n_features
    B = 2

    mod = FeatureFusionPallas(jax.random.PRNGKey(0),
                              embed_dim=embed_dim, n_features=n_features)

    fk = jax.random.split(jax.random.PRNGKey(0), 4)
    mask_features = jax.random.normal(fk[0], (B, embed_dim, 32, 32), jnp.float32)
    # three lower-resolution feature maps (as produced by a pyramid decoder)
    maps = [
        jax.random.normal(fk[1], (B, embed_dim, 4, 4), jnp.float32),
        jax.random.normal(fk[2], (B, embed_dim, 8, 8), jnp.float32),
        jax.random.normal(fk[3], (B, embed_dim, 16, 16), jnp.float32),
    ]

    out = jax.block_until_ready(mod(maps, mask_features))

    assert out.shape == (B, embed_dim, 32, 32)
    assert bool(jnp.all(jnp.isfinite(out)))
    assert bool(jnp.all(out >= 0.0))      # ReLU epilogue

    ref = jax.block_until_ready(reference_forward(mod, maps, mask_features))
    max_err = float(jnp.max(jnp.abs(out - ref)))
    assert max_err < 0.1, f"max abs diff vs f32 reference too large: {max_err}"

    print("KERNEL_OK")
</pallas_src>

<mosaic_0001>
module attributes {stable_mosaic.version = 11 : i64} {
  func.func @_fusion_kernel(%arg0: i32, %arg1: i32, %arg2: memref<1x128x512xf32, #tpu.memory_space<vmem>>, %arg3: memref<1x128x512xbf16, #tpu.memory_space<vmem>>, %arg4: memref<128x128xbf16, #tpu.memory_space<vmem>>, %arg5: memref<128x1xf32, #tpu.memory_space<vmem>>, %arg6: memref<1x128x512xf32, #tpu.memory_space<vmem>>) attributes {dimension_semantics = [#tpu.dimension_semantics<parallel>, #tpu.dimension_semantics<parallel>], iteration_bounds = array<i64: 2, 2>, scalar_prefetch = 0 : i64, scratch_operands = 0 : i64, tpu.core_type = #tpu.core_type<tc>, window_params = [{transform_indices = @transform_0, window_bounds = array<i64: 1, 128, 512>}, {transform_indices = @transform_1, window_bounds = array<i64: 1, 128, 512>}, {pipeline_mode = #tpu.pipeline_mode<synchronous>, transform_indices = @transform_2, window_bounds = array<i64: 128, 128>}, {pipeline_mode = #tpu.pipeline_mode<synchronous>, transform_indices = @transform_3, window_bounds = array<i64: 128, 1>}, {transform_indices = @transform_4, window_bounds = array<i64: 1, 128, 512>}]} {
    %c0 = arith.constant 0 : index
    %c0_0 = arith.constant 0 : index
    %c0_1 = arith.constant 0 : index
    %0 = vector.load %arg2[%c0, %c0_0, %c0_1] : memref<1x128x512xf32, #tpu.memory_space<vmem>>, vector<1x128x512xf32>
    %1 = vector.shape_cast %0 : vector<1x128x512xf32> to vector<128x512xf32>
    %2 = arith.truncf %1 : vector<128x512xf32> to vector<128x512xbf16>
    %c0_2 = arith.constant 0 : index
    %c0_3 = arith.constant 0 : index
    %3 = vector.load %arg4[%c0_2, %c0_3] : memref<128x128xbf16, #tpu.memory_space<vmem>>, vector<128x128xbf16>
    %cst = arith.constant dense<0.000000e+00> : vector<128x512xf32>
    %4 = tpu.matmul %3, %2, %cst {dimension_numbers = #tpu.dot_dimension_numbers<[1], [0], [0], [1], [0, 0, 1, 1], [], []>} : vector<128x128xbf16>, vector<128x512xbf16>, vector<128x512xf32> -> vector<128x512xf32>
    %c0_4 = arith.constant 0 : index
    %c0_5 = arith.constant 0 : index
    %c0_6 = arith.constant 0 : index
    %5 = vector.load %arg3[%c0_4, %c0_5, %c0_6] : memref<1x128x512xbf16, #tpu.memory_space<vmem>>, vector<1x128x512xbf16>
    %6 = vector.shape_cast %5 : vector<1x128x512xbf16> to vector<128x512xbf16>
    %7 = arith.extf %6 : vector<128x512xbf16> to vector<128x512xf32>
    %8 = arith.addf %4, %7 : vector<128x512xf32>
    %c0_7 = arith.constant 0 : index
    %c0_8 = arith.constant 0 : index
    %9 = vector.load %arg5[%c0_7, %c0_8] : memref<128x1xf32, #tpu.memory_space<vmem>>, vector<128x1xf32>
    %10 = vector.broadcast %9 : vector<128x1xf32> to vector<128x512xf32>
    %11 = arith.addf %8, %10 : vector<128x512xf32>
    %cst_9 = arith.constant 0.000000e+00 : f32
    %12 = vector.broadcast %cst_9 : f32 to vector<128x512xf32>
    %13 = arith.maximumf %11, %12 : vector<128x512xf32>
    %c0_10 = arith.constant 0 : index
    %c0_11 = arith.constant 0 : index
    %c0_12 = arith.constant 0 : index
    %14 = vector.load %arg6[%c0_10, %c0_11, %c0_12] : memref<1x128x512xf32, #tpu.memory_space<vmem>>, vector<1x128x512xf32>
    %15 = vector.shape_cast %14 : vector<1x128x512xf32> to vector<128x512xf32>
    %16 = vector.shape_cast %13 : vector<128x512xf32> to vector<1x128x512xf32>
    tpu.vector_store %arg6[%c0_10, %c0_11, %c0_12], %16 {strides = array<i32>} : memref<1x128x512xf32, #tpu.memory_space<vmem>>, vector<1x128x512xf32>,
    return
  }
  func.func @transform_0(%arg0: i32, %arg1: i32) -> (i32, i32, i32) {
    %c0_i32 = arith.constant 0 : i32
    %c0_i32_0 = arith.constant 0 : i32
    return %arg0, %c0_i32, %arg1 : i32, i32, i32
  }
  func.func @transform_1(%arg0: i32, %arg1: i32) -> (i32, i32, i32) {
    %c0_i32 = arith.constant 0 : i32
    %c0_i32_0 = arith.constant 0 : i32
    return %arg0, %c0_i32, %arg1 : i32, i32, i32
  }
  func.func @transform_2(%arg0: i32, %arg1: i32) -> (i32, i32) {
    %c0_i32 = arith.constant 0 : i32
    %c0_i32_0 = arith.constant 0 : i32
    %c0_i32_1 = arith.constant 0 : i32
    return %c0_i32, %c0_i32_0 : i32, i32
  }
  func.func @transform_3(%arg0: i32, %arg1: i32) -> (i32, i32) {
    %c0_i32 = arith.constant 0 : i32
    %c0_i32_0 = arith.constant 0 : i32
    %c0_i32_1 = arith.constant 0 : i32
    return %c0_i32, %c0_i32_0 : i32, i32
  }
  func.func @transform_4(%arg0: i32, %arg1: i32) -> (i32, i32, i32) {
    %c0_i32 = arith.constant 0 : i32
    %c0_i32_0 = arith.constant 0 : i32
    return %arg0, %c0_i32, %arg1 : i32, i32, i32
  }
}

</mosaic_0001>

<bundles_post_ra>
// kernel: _forward_impl.1
= control target key start
LH: loop header
LB: loop body
LE: loop exit
PB: predicated region body
PF: predicated region fallthrough
CT: control target
= control target key end

     0   :  { %s1659_s15 = smov 0   ;;  %s1661_s16 = smov 0   ;;  %s2345_s0 = inlined_call_operand.vmem [shape: f32[2,128,1024], index: 0, kind: input, shape index: {}]   ;;  %s2346_s1 = inlined_call_operand.vmem [shape: bf16[2,128,1024], index: 1, kind: input, shape index: {}]   ;;  %s2347_s2 = inlined_call_operand.vmem [shape: bf16[128,128], index: 2, kind: input, shape index: {}]   ;;  %s2348_s3 = inlined_call_operand.vmem [shape: f32[128,1], index: 3, kind: input, shape index: {}]   ;;  %s2349_s4 = inlined_call_operand.vmem [shape: f32[2,128,1024], index: 4, kind: output, shape index: {}]  }
   0x1   :  { %s1663_s17 = smov 0   ;;  %s1665_s18 = smov 0  }
   0x2   :  { %s1667_s19 = smov 0   ;;  %s1669_s20 = smov 0  }
   0x3   :  { %s1671_s21 = smov 0  }
   0x4 LB: > { %s23_s22 = sadd.s32 1, %s1623_s19  ;;  %s26_s23 = sadd.s32 1, %s1627_s20  ;;  %s1631_s21 = sphi %s1671_s21, %s14_s21   ;;  %s1627_s20 = sphi %s1669_s20, %s2357_s20   ;;  %s1623_s19 = sphi %s1667_s19, %s2356_s19   ;;  %s1619_s18 = sphi %s1665_s18, %s2355_s18   ;;  %s1615_s17 = sphi %s1663_s17, %s2354_s17   ;;  %s1611_s16 = sphi %s1661_s16, %s2353_s16   ;;  %s1607_s15 = sphi %s1659_s15, %s2352_s15  }
   0x5   : > { %p24_p0 = scmp.ge.s32.totalorder %s23_s22, 2  ;;  %s1455_s24 = sadd.s32 4294967295, %s1631_s21  }
   0x6   : > { %p42_p1 = scmp.ne.s32.totalorder %s1611_s16, %s1607_s15  ;;  %p43_p2 = scmp.eq.s32.totalorder %s1631_s21, 0 }
   0x7   : > { %s2359_s22 = smov (%p24_p0, %s23_s22), 0  ;;  %s2361_s23 = smov (!%p24_p0, %s26_s23), %s1627_s20 }
   0x8   : > { %p28_p3 = scmp.ge.s32.totalorder %s2361_s23, 2  ;;  %p144_p4 = scmp.eq.s32.totalorder %s1455_s24, 3 }
   0x9   : > { %s31_s25 = ssub.s32 %s1623_s19, %s2359_s22  ;;  %p1705_p5 = por %p43_p2, %p42_p1 }
   0xa   : > { %s2363_s23 = smov (%p28_p3, %s2361_s23), 0  ;;  %p1711_p6 = por %p144_p4, %p42_p1 }
   0xb   : > { %s30_s28 = ssub.s32 %s1627_s20, %s2363_s23  ;;  %s35_s30 = sadd.s32 1, %s1611_s16 }
   0xc   : > { %s32_s29 = sor.u32 %s31_s25, %s30_s28  ;;  %p1458_p8 = scmp.ge.s32.totalorder %s1631_s21, 4 }
   0xd   : > { %p33_p7 = scmp.eq.s32.totalorder %s32_s29, 0 }
   0xe   : > { %172 = sbr.rel (%p1458_p8) target bundleno = 129 (0x81), region = 24 }
   0xf   : > { %s1719_s5 = scalar_select %p33_p7, %s1611_s16, %s35_s30  }
  0x13   : > { %175 = sbr.rel (!%p1705_p5) target bundleno = 90 (0x5a), region = 28  ;;  %s177_s6 = sand.u32 (%p1705_p5), 1, %s1611_s16  }
  0x14   : > { %s1460_s7 = sshll.u32 (%p1705_p5), %s1623_s19, 2  ;;  %s1459_s8 = sshll.u32 (%p1705_p5), %s177_s6, 9 }
  0x15   : > { %s1461_s9 = sshll.u32 (%p1705_p5), %s1627_s20, 7  ;;  %s1735_s24 = scalar_lea.vmem (%p1705_p5), [#allocation2], %s1459_s8 }
  0x16   : > { %s182_s10 = sadd.s32 (%p1705_p5), %s1461_s9, %s1460_s7 }
  0x17   : > { %s1462_s11 = sshll.u32 (%p1705_p5), %s182_s10, 3 }
  0x18   : > { %s1730_s14 = scalar_lea.vmem %s2345_s0, %s1462_s11 }
  0x19   : > { %v197_v0 = vld [vmem:[%s1730_s14] sm:$0xff]  ;;  %v199_v1 = vld [vmem:[%s1730_s14 + $0x8] sm:$0xff]  ;;  %v201_v2 = vld [vmem:[%s1730_s14 + $0x10] sm:$0xff] }
  0x1a   : > { %198 = vst [vmem:[%s1735_s24] sm:$0xff] %v197_v0  ;;  %v203_v3 = vld [vmem:[%s1730_s14 + $0x18] sm:$0xff]  ;;  %v205_v4 = vld [vmem:[%s1730_s14 + $0x40] sm:$0xff]  ;;  %v207_v5 = vld [vmem:[%s1730_s14 + $0x48] sm:$0xff] }
  0x1b   : > { %200 = vst [vmem:[%s1735_s24 + $0x8] sm:$0xff] %v199_v1  ;;  %v209_v6 = vld [vmem:[%s1730_s14 + $0x50] sm:$0xff]  ;;  %v211_v7 = vld [vmem:[%s1730_s14 + $0x58] sm:$0xff]  ;;  %v213_v8 = vld [vmem:[%s1730_s14 + $0x80] sm:$0xff] }
  0x1c   : > { %202 = vst [vmem:[%s1735_s24 + $0x10] sm:$0xff] %v201_v2  ;;  %v215_v9 = vld [vmem:[%s1730_s14 + $0x88] sm:$0xff]  ;;  %v217_v10 = vld [vmem:[%s1730_s14 + $0x90] sm:$0xff]  ;;  %v219_v11 = vld [vmem:[%s1730_s14 + $0x98] sm:$0xff] }
  0x1d   : > { %204 = vst [vmem:[%s1735_s24 + $0x18] sm:$0xff] %v203_v3  ;;  %v221_v12 = vld [vmem:[%s1730_s14 + $0xc0] sm:$0xff]  ;;  %v223_v13 = vld [vmem:[%s1730_s14 + $0xc8] sm:$0xff]  ;;  %v225_v14 = vld [vmem:[%s1730_s14 + $0xd0] sm:$0xff] }
  0x1e   : > { %206 = vst [vmem:[%s1735_s24 + $0x20] sm:$0xff] %v205_v4  ;;  %v227_v15 = vld [vmem:[%s1730_s14 + $0xd8] sm:$0xff]  ;;  %v229_v16 = vld [vmem:[%s1730_s14 + $0x100] sm:$0xff]  ;;  %v231_v17 = vld [vmem:[%s1730_s14 + $0x108] sm:$0xff] }
  0x1f   : > { %208 = vst [vmem:[%s1735_s24 + $0x28] sm:$0xff] %v207_v5  ;;  %v233_v18 = vld [vmem:[%s1730_s14 + $0x110] sm:$0xff]  ;;  %v235_v19 = vld [vmem:[%s1730_s14 + $0x118] sm:$0xff]  ;;  %v237_v20 = vld [vmem:[%s1730_s14 + $0x140] sm:$0xff] }
  0x20   : > { %210 = vst [vmem:[%s1735_s24 + $0x30] sm:$0xff] %v209_v6  ;;  %v239_v21 = vld [vmem:[%s1730_s14 + $0x148] sm:$0xff]  ;;  %v241_v22 = vld [vmem:[%s1730_s14 + $0x150] sm:$0xff]  ;;  %v243_v23 = vld [vmem:[%s1730_s14 + $0x158] sm:$0xff] }
  0x21   : > { %212 = vst [vmem:[%s1735_s24 + $0x38] sm:$0xff] %v211_v7  ;;  %v245_v24 = vld [vmem:[%s1730_s14 + $0x180] sm:$0xff]  ;;  %v247_v25 = vld [vmem:[%s1730_s14 + $0x188] sm:$0xff]  ;;  %v249_v26 = vld [vmem:[%s1730_s14 + $0x190] sm:$0xff] }
  0x22   : > { %214 = vst [vmem:[%s1735_s24 + $0x40] sm:$0xff] %v213_v8  ;;  %v251_v27 = vld [vmem:[%s1730_s14 + $0x198] sm:$0xff]  ;;  %v253_v28 = vld [vmem:[%s1730_s14 + $0x1c0] sm:$0xff]  ;;  %v255_v29 = vld [vmem:[%s1730_s14 + $0x1c8] sm:$0xff] }
  0x23   : > { %216 = vst [vmem:[%s1735_s24 + $0x48] sm:$0xff] %v215_v9  ;;  %v257_v30 = vld [vmem:[%s1730_s14 + $0x1d0] sm:$0xff]  ;;  %v259_v31 = vld [vmem:[%s1730_s14 + $0x1d8] sm:$0xff]  ;;  %v261_v32 = vld [vmem:[%s1730_s14 + $0x200] sm:$0xff] }
  0x24   : > { %218 = vst [vmem:[%s1735_s24 + $0x50] sm:$0xff] %v217_v10  ;;  %v263_v33 = vld [vmem:[%s1730_s14 + $0x208] sm:$0xff]  ;;  %v265_v34 = vld [vmem:[%s1730_s14 + $0x210] sm:$0xff]  ;;  %v267_v35 = vld [vmem:[%s1730_s14 + $0x218] sm:$0xff] }
  0x25   : > { %220 = vst [vmem:[%s1735_s24 + $0x58] sm:$0xff] %v219_v11  ;;  %v269_v36 = vld [vmem:[%s1730_s14 + $0x240] sm:$0xff]  ;;  %v271_v37 = vld [vmem:[%s1730_s14 + $0x248] sm:$0xff]  ;;  %v273_v38 = vld [vmem:[%s1730_s14 + $0x250] sm:$0xff] }
  0x26   : > { %222 = vst [vmem:[%s1735_s24 + $0x60] sm:$0xff] %v221_v12  ;;  %v275_v39 = vld [vmem:[%s1730_s14 + $0x258] sm:$0xff]  ;;  %v277_v40 = vld [vmem:[%s1730_s14 + $0x280] sm:$0xff]  ;;  %v279_v41 = vld [vmem:[%s1730_s14 + $0x288] sm:$0xff] }
  0x27   : > { %224 = vst [vmem:[%s1735_s24 + $0x68] sm:$0xff] %v223_v13  ;;  %v281_v42 = vld [vmem:[%s1730_s14 + $0x290] sm:$0xff]  ;;  %v283_v43 = vld [vmem:[%s1730_s14 + $0x298] sm:$0xff]  ;;  %v285_v44 = vld [vmem:[%s1730_s14 + $0x2c0] sm:$0xff] }
  0x28   : > { %226 = vst [vmem:[%s1735_s24 + $0x70] sm:$0xff] %v225_v14  ;;  %v287_v45 = vld [vmem:[%s1730_s14 + $0x2c8] sm:$0xff]  ;;  %v289_v46 = vld [vmem:[%s1730_s14 + $0x2d0] sm:$0xff]  ;;  %v291_v47 = vld [vmem:[%s1730_s14 + $0x2d8] sm:$0xff] }
  0x29   : > { %228 = vst [vmem:[%s1735_s24 + $0x78] sm:$0xff] %v227_v15  ;;  %v293_v48 = vld [vmem:[%s1730_s14 + $0x300] sm:$0xff]  ;;  %v295_v49 = vld [vmem:[%s1730_s14 + $0x308] sm:$0xff]  ;;  %v297_v50 = vld [vmem:[%s1730_s14 + $0x310] sm:$0xff] }
  0x2a   : > { %230 = vst [vmem:[%s1735_s24 + $0x80] sm:$0xff] %v229_v16  ;;  %v299_v51 = vld [vmem:[%s1730_s14 + $0x318] sm:$0xff]  ;;  %v301_v52 = vld [vmem:[%s1730_s14 + $0x340] sm:$0xff]  ;;  %v303_v53 = vld [vmem:[%s1730_s14 + $0x348] sm:$0xff] }
  0x2b   : > { %232 = vst [vmem:[%s1735_s24 + $0x88] sm:$0xff] %v231_v17  ;;  %v305_v54 = vld [vmem:[%s1730_s14 + $0x350] sm:$0xff]  ;;  %v307_v55 = vld [vmem:[%s1730_s14 + $0x358] sm:$0xff]  ;;  %v309_v56 = vld [vmem:[%s1730_s14 + $0x380] sm:$0xff] }
  0x2c   : > { %234 = vst [vmem:[%s1735_s24 + $0x90] sm:$0xff] %v233_v18  ;;  %v311_v57 = vld [vmem:[%s1730_s14 + $0x388] sm:$0xff]  ;;  %v313_v58 = vld [vmem:[%s1730_s14 + $0x390] sm:$0xff]  ;;  %v315_v59 = vld [vmem:[%s1730_s14 + $0x398] sm:$0xff] }
  0x2d   : > { %236 = vst [vmem:[%s1735_s24 + $0x98] sm:$0xff] %v235_v19  ;;  %v317_v60 = vld [vmem:[%s1730_s14 + $0x3c0] sm:$0xff]  ;;  %v319_v61 = vld [vmem:[%s1730_s14 + $0x3c8] sm:$0xff]  ;;  %v321_v62 = vld [vmem:[%s1730_s14 + $0x3d0] sm:$0xff] }
  0x2e   : > { %238 = vst [vmem:[%s1735_s24 + $0xa0] sm:$0xff] %v237_v20  ;;  %v323_v63 = vld [vmem:[%s1730_s14 + $0x3d8] sm:$0xff] }
  0x2f   : > { %240 = vst [vmem:[%s1735_s24 + $0xa8] sm:$0xff] %v239_v21 }
  0x30   : > { %242 = vst [vmem:[%s1735_s24 + $0xb0] sm:$0xff] %v241_v22 }
  0x31   : > { %244 = vst [vmem:[%s1735_s24 + $0xb8] sm:$0xff] %v243_v23 }
  0x32   : > { %246 = vst [vmem:[%s1735_s24 + $0xc0] sm:$0xff] %v245_v24 }
  0x33   : > { %248 = vst [vmem:[%s1735_s24 + $0xc8] sm:$0xff] %v247_v25 }
  0x34   : > { %250 = vst [vmem:[%s1735_s24 + $0xd0] sm:$0xff] %v249_v26 }
  0x35   : > { %252 = vst [vmem:[%s1735_s24 + $0xd8] sm:$0xff] %v251_v27 }
  0x36   : > { %254 = vst [vmem:[%s1735_s24 + $0xe0] sm:$0xff] %v253_v28 }
  0x37   : > { %256 = vst [vmem:[%s1735_s24 + $0xe8] sm:$0xff] %v255_v29 }
  0x38   : > { %258 = vst [vmem:[%s1735_s24 + $0xf0] sm:$0xff] %v257_v30 }
  0x39   : > { %260 = vst [vmem:[%s1735_s24 + $0xf8] sm:$0xff] %v259_v31 }
  0x3a   : > { %262 = vst [vmem:[%s1735_s24 + $0x100] sm:$0xff] %v261_v32 }
  0x3b   : > { %264 = vst [vmem:[%s1735_s24 + $0x108] sm:$0xff] %v263_v33 }
  0x3c   : > { %266 = vst [vmem:[%s1735_s24 + $0x110] sm:$0xff] %v265_v34 }
  0x3d   : > { %268 = vst [vmem:[%s1735_s24 + $0x118] sm:$0xff] %v267_v35 }
  0x3e   : > { %270 = vst [vmem:[%s1735_s24 + $0x120] sm:$0xff] %v269_v36 }
  0x3f   : > { %272 = vst [vmem:[%s1735_s24 + $0x128] sm:$0xff] %v271_v37 }
  0x40   : > { %274 = vst [vmem:[%s1735_s24 + $0x130] sm:$0xff] %v273_v38 }
  0x41   : > { %276 = vst [vmem:[%s1735_s24 + $0x138] sm:$0xff] %v275_v39 }
  0x42   : > { %278 = vst [vmem:[%s1735_s24 + $0x140] sm:$0xff] %v277_v40 }
  0x43   : > { %280 = vst [vmem:[%s1735_s24 + $0x148] sm:$0xff] %v279_v41 }
  0x44   : > { %282 = vst [vmem:[%s1735_s24 + $0x150] sm:$0xff] %v281_v42 }
  0x45   : > { %284 = vst [vmem:[%s1735_s24 + $0x158] sm:$0xff] %v283_v43 }
  0x46   : > { %286 = vst [vmem:[%s1735_s24 + $0x160] sm:$0xff] %v285_v44 }
  0x47   : > { %288 = vst [vmem:[%s1735_s24 + $0x168] sm:$0xff] %v287_v45 }
  0x48   : > { %290 = vst [vmem:[%s1735_s24 + $0x170] sm:$0xff] %v289_v46 }
  0x49   : > { %292 = vst [vmem:[%s1735_s24 + $0x178] sm:$0xff] %v291_v47 }
  0x4a   : > { %294 = vst [vmem:[%s1735_s24 + $0x180] sm:$0xff] %v293_v48 }
  0x4b   : > { %296 = vst [vmem:[%s1735_s24 + $0x188] sm:$0xff] %v295_v49 }
  0x4c   : > { %298 = vst [vmem:[%s1735_s24 + $0x190] sm:$0xff] %v297_v50 }
  0x4d   : > { %300 = vst [vmem:[%s1735_s24 + $0x198] sm:$0xff] %v299_v51 }
  0x4e   : > { %302 = vst [vmem:[%s1735_s24 + $0x1a0] sm:$0xff] %v301_v52 }
  0x4f   : > { %304 = vst [vmem:[%s1735_s24 + $0x1a8] sm:$0xff] %v303_v53 }
  0x50   : > { %306 = vst [vmem:[%s1735_s24 + $0x1b0] sm:$0xff] %v305_v54 }
  0x51   : > { %308 = vst [vmem:[%s1735_s24 + $0x1b8] sm:$0xff] %v307_v55 }
  0x52   : > { %310 = vst [vmem:[%s1735_s24 + $0x1c0] sm:$0xff] %v309_v56 }
  0x53   : > { %312 = vst [vmem:[%s1735_s24 + $0x1c8] sm:$0xff] %v311_v57 }
  0x54   : > { %314 = vst [vmem:[%s1735_s24 + $0x1d0] sm:$0xff] %v313_v58 }
  0x55   : > { %316 = vst [vmem:[%s1735_s24 + $0x1d8] sm:$0xff] %v315_v59 }
  0x56   : > { %318 = vst [vmem:[%s1735_s24 + $0x1e0] sm:$0xff] %v317_v60 }
  0x57   : > { %320 = vst [vmem:[%s1735_s24 + $0x1e8] sm:$0xff] %v319_v61 }
  0x58   : > { %322 = vst [vmem:[%s1735_s24 + $0x1f0] sm:$0xff] %v321_v62 }
  0x59   : > { %324 = vst [vmem:[%s1735_s24 + $0x1f8] sm:$0xff] %v323_v63 }
  0x5a PF: > { %330 = sbr.rel (!%p1705_p5) target bundleno = 129 (0x81), region = 51  ;;  %s332_s25 = sand.u32 (%p1705_p5), 1, %s1611_s16  }
  0x5b   : > { %s1464_s28 = sshll.u32 (%p1705_p5), %s1623_s19, 2  ;;  %s1463_s29 = sshll.u32 (%p1705_p5), %s332_s25, 8 }
  0x5c   : > { %s1465_s30 = sshll.u32 (%p1705_p5), %s1627_s20, 7  ;;  %s1875_s26 = scalar_lea.vmem (%p1705_p5), [#allocation3], %s1463_s29 }
  0x5d   : > { %s337_s6 = sadd.s32 (%p1705_p5), %s1465_s30, %s1464_s28 }
  0x5e   : > { %s1466_s7 = sshll.u32 (%p1705_p5), %s337_s6, 2 }
  0x5f   : > { %s1870_s10 = scalar_lea.vmem %s2346_s1, %s1466_s7 }
  0x60   : > { %v352_v0 = vld [vmem:[%s1870_s10] sm:$0xff]  ;;  %v354_v1 = vld [vmem:[%s1870_s10 + $0x8] sm:$0xff] }
  0x61   : > { %v356_v2 = vld [vmem:[%s1870_s10 + $0x20] sm:$0xff]  ;;  %353 = vst [vmem:[%s1875_s26] sm:$0xff] %v352_v0  ;;  %v358_v3 = vld [vmem:[%s1870_s10 + $0x28] sm:$0xff] }
  0x62   : > { %355 = vst [vmem:[%s1875_s26 + $0x8] sm:$0xff] %v354_v1  ;;  %v360_v4 = vld [vmem:[%s1870_s10 + $0x40] sm:$0xff]  ;;  %v362_v5 = vld [vmem:[%s1870_s10 + $0x48] sm:$0xff] }
  0x63   : > { %357 = vst [vmem:[%s1875_s26 + $0x10] sm:$0xff] %v356_v2  ;;  %v364_v6 = vld [vmem:[%s1870_s10 + $0x60] sm:$0xff]  ;;  %v366_v7 = vld [vmem:[%s1870_s10 + $0x68] sm:$0xff] }
  0x64   : > { %359 = vst [vmem:[%s1875_s26 + $0x18] sm:$0xff] %v358_v3  ;;  %v368_v8 = vld [vmem:[%s1870_s10 + $0x80] sm:$0xff]  ;;  %v370_v9 = vld [vmem:[%s1870_s10 + $0x88] sm:$0xff] }
  0x65   : > { %361 = vst [vmem:[%s1875_s26 + $0x20] sm:$0xff] %v360_v4  ;;  %v372_v10 = vld [vmem:[%s1870_s10 + $0xa0] sm:$0xff]  ;;  %v374_v11 = vld [vmem:[%s1870_s10 + $0xa8] sm:$0xff] }
  0x66   : > { %363 = vst [vmem:[%s1875_s26 + $0x28] sm:$0xff] %v362_v5  ;;  %v376_v12 = vld [vmem:[%s1870_s10 + $0xc0] sm:$0xff]  ;;  %v378_v13 = vld [vmem:[%s1870_s10 + $0xc8] sm:$0xff] }
  0x67   : > { %365 = vst [vmem:[%s1875_s26 + $0x30] sm:$0xff] %v364_v6  ;;  %v380_v14 = vld [vmem:[%s1870_s10 + $0xe0] sm:$0xff]  ;;  %v382_v15 = vld [vmem:[%s1870_s10 + $0xe8] sm:$0xff] }
  0x68   : > { %367 = vst [vmem:[%s1875_s26 + $0x38] sm:$0xff] %v366_v7  ;;  %v384_v16 = vld [vmem:[%s1870_s10 + $0x100] sm:$0xff]  ;;  %v386_v17 = vld [vmem:[%s1870_s10 + $0x108] sm:$0xff] }
  0x69   : > { %369 = vst [vmem:[%s1875_s26 + $0x40] sm:$0xff] %v368_v8  ;;  %v388_v18 = vld [vmem:[%s1870_s10 + $0x120] sm:$0xff]  ;;  %v390_v19 = vld [vmem:[%s1870_s10 + $0x128] sm:$0xff] }
  0x6a   : > { %371 = vst [vmem:[%s1875_s26 + $0x48] sm:$0xff] %v370_v9  ;;  %v392_v20 = vld [vmem:[%s1870_s10 + $0x140] sm:$0xff]  ;;  %v394_v21 = vld [vmem:[%s1870_s10 + $0x148] sm:$0xff] }
  0x6b   : > { %373 = vst [vmem:[%s1875_s26 + $0x50] sm:$0xff] %v372_v10  ;;  %v396_v22 = vld [vmem:[%s1870_s10 + $0x160] sm:$0xff]  ;;  %v398_v23 = vld [vmem:[%s1870_s10 + $0x168] sm:$0xff] }
  0x6c   : > { %375 = vst [vmem:[%s1875_s26 + $0x58] sm:$0xff] %v374_v11  ;;  %v400_v24 = vld [vmem:[%s1870_s10 + $0x180] sm:$0xff]  ;;  %v402_v25 = vld [vmem:[%s1870_s10 + $0x188] sm:$0xff] }
  0x6d   : > { %377 = vst [vmem:[%s1875_s26 + $0x60] sm:$0xff] %v376_v12  ;;  %v404_v26 = vld [vmem:[%s1870_s10 + $0x1a0] sm:$0xff]  ;;  %v406_v27 = vld [vmem:[%s1870_s10 + $0x1a8] sm:$0xff] }
  0x6e   : > { %379 = vst [vmem:[%s1875_s26 + $0x68] sm:$0xff] %v378_v13  ;;  %v408_v28 = vld [vmem:[%s1870_s10 + $0x1c0] sm:$0xff]  ;;  %v410_v29 = vld [vmem:[%s1870_s10 + $0x1c8] sm:$0xff] }
  0x6f   : > { %381 = vst [vmem:[%s1875_s26 + $0x70] sm:$0xff] %v380_v14  ;;  %v412_v30 = vld [vmem:[%s1870_s10 + $0x1e0] sm:$0xff]  ;;  %v414_v31 = vld [vmem:[%s1870_s10 + $0x1e8] sm:$0xff] }
  0x70   : > { %383 = vst [vmem:[%s1875_s26 + $0x78] sm:$0xff] %v382_v15 }
  0x71   : > { %385 = vst [vmem:[%s1875_s26 + $0x80] sm:$0xff] %v384_v16 }
  0x72   : > { %387 = vst [vmem:[%s1875_s26 + $0x88] sm:$0xff] %v386_v17 }
  0x73   : > { %389 = vst [vmem:[%s1875_s26 + $0x90] sm:$0xff] %v388_v18 }
  0x74   : > { %391 = vst [vmem:[%s1875_s26 + $0x98] sm:$0xff] %v390_v19 }
  0x75   : > { %393 = vst [vmem:[%s1875_s26 + $0xa0] sm:$0xff] %v392_v20 }
  0x76   : > { %395 = vst [vmem:[%s1875_s26 + $0xa8] sm:$0xff] %v394_v21 }
  0x77   : > { %397 = vst [vmem:[%s1875_s26 + $0xb0] sm:$0xff] %v396_v22 }
  0x78   : > { %399 = vst [vmem:[%s1875_s26 + $0xb8] sm:$0xff] %v398_v23 }
  0x79   : > { %401 = vst [vmem:[%s1875_s26 + $0xc0] sm:$0xff] %v400_v24 }
  0x7a   : > { %403 = vst [vmem:[%s1875_s26 + $0xc8] sm:$0xff] %v402_v25 }
  0x7b   : > { %405 = vst [vmem:[%s1875_s26 + $0xd0] sm:$0xff] %v404_v26 }
  0x7c   : > { %407 = vst [vmem:[%s1875_s26 + $0xd8] sm:$0xff] %v406_v27 }
  0x7d   : > { %409 = vst [vmem:[%s1875_s26 + $0xe0] sm:$0xff] %v408_v28 }
  0x7e   : > { %411 = vst [vmem:[%s1875_s26 + $0xe8] sm:$0xff] %v410_v29 }
  0x7f   : > { %413 = vst [vmem:[%s1875_s26 + $0xf0] sm:$0xff] %v412_v30 }
  0x80   : > { %415 = vst [vmem:[%s1875_s26 + $0xf8] sm:$0xff] %v414_v31 }
  0x81 PF: > { %p1467_p9 = scmp.ge.s32.totalorder %s1631_s21, 1  ;;  %p420_p10 = scmp.lt.s32.totalorder %s1631_s21, 5 }
  0x83   : > { %p421_p11 = pnand %p1467_p9, %p420_p10 }
  0x84   : > { %s427_s11 = sand.u32 (!%p421_p11), 1, %s1607_s15  }
  0x85   : > { %424 = sbr.rel (%p421_p11) target bundleno = 481 (0x1e1), region = 74  ;;  %s1943_s12 = sshll.u32 (!%p421_p11), %s427_s11, 9 }
  0x86   : > { %s1946_s13 = scalar_lea.vmem (!%p421_p11), [#allocation2], %s1943_s12  ;;  %s1469_s9 = sshll.u32 (!%p421_p11), %s427_s11, 8 }
  0x87   : > { %s2086_s10 = scalar_lea.vmem (!%p421_p11), [#allocation3], %s1469_s9  ;;  %s2092_s15 = scalar_lea.vmem (!%p421_p11), [#allocation4], %s1943_s12 }
  0x8a   : > { %v521_v32 = vld [vmem:[%s1946_s13 + $0x1c0] sm:$0xff]  ;;  %v522_v34 = vld [vmem:[%s1946_s13 + $0x1c8] sm:$0xff]  ;;  %v523_v37 = vld [vmem:[%s1946_s13 + $0x1d0] sm:$0xff]  ;;  %v1633_v57 = vmov 0   ;;  %s1504_s11 = sshll.u32 (%p1711_p6), %s1615_s17, 2  ;;  %s1505_s12 = sshll.u32 (%p1711_p6), %s1619_s18, 7 }
  0x8b   : > { %v525_v33 = vld [vmem:[%s1946_s13 + $0x1e0] sm:$0xff]  ;;  %v526_v36 = vld [vmem:[%s1946_s13 + $0x1e8] sm:$0xff]  ;;  %v527_v38 = vld [vmem:[%s1946_s13 + $0x1f0] sm:$0xff]  ;;  %1574 = vset.pattern.permute.xlu0 %v1633_v57  ;;  %1575 = vset.pattern.permute.xlu1 %v1633_v57  ;;  %s1214_s26 = sadd.s32 (%p1711_p6), %s1505_s12, %s1504_s11 }
  0x8c   : > { %v557_v35 = vpack.c.bf16 %v525_v33, %v521_v32  ;;  %v558_v39 = vpack.c.bf16 %v526_v36, %v522_v34  ;;  %v559_v40 = vpack.c.bf16 %v527_v38, %v523_v37  ;;  %v524_v41 = vld [vmem:[%s1946_s13 + $0x1d8] sm:$0xff]  ;;  %v513_v43 = vld [vmem:[%s1946_s13 + $0x180] sm:$0xff]  ;;  %v514_v46 = vld [vmem:[%s1946_s13 + $0x188] sm:$0xff]  ;;  %1576 = vset.pattern.permute.xlu2 %v1633_v57 }
  0x8d   : > { %v528_v42 = vld [vmem:[%s1946_s13 + $0x1f8] sm:$0xff]  ;;  %v517_v45 = vld [vmem:[%s1946_s13 + $0x1a0] sm:$0xff]  ;;  %v518_v47 = vld [vmem:[%s1946_s13 + $0x1a8] sm:$0xff] }
  0x8e   : > { %721 = vmatpush.bf16.msra.mxu0 %v557_v35  ;;  %v560_v44 = vpack.c.bf16 %v528_v42, %v524_v41  ;;  %770 = vmatpush.bf16.msra.mxu1 %v558_v39  ;;  %v553_v48 = vpack.c.bf16 %v517_v45, %v513_v43  ;;  %v554_v49 = vpack.c.bf16 %v518_v47, %v514_v46  ;;  %v515_v50 = vld [vmem:[%s1946_s13 + $0x190] sm:$0xff]  ;;  %v516_v52 = vld [vmem:[%s1946_s13 + $0x198] sm:$0xff]  ;;  %v505_v55 = vld [vmem:[%s1946_s13 + $0x140] sm:$0xff] }
  0x8f   : > { %819 = vmatpush.bf16.msra.mxu2 %v559_v40  ;;  %v519_v51 = vld [vmem:[%s1946_s13 + $0x1b0] sm:$0xff]  ;;  %v520_v54 = vld [vmem:[%s1946_s13 + $0x1b8] sm:$0xff]  ;;  %v509_v56 = vld [vmem:[%s1946_s13 + $0x160] sm:$0xff] }
  0x90   : > { %868 = vmatpush.bf16.msra.mxu3 %v560_v44  ;;  %v555_v53 = vpack.c.bf16 %v519_v51, %v515_v50  ;;  %v556_v58 = vpack.c.bf16 %v520_v54, %v516_v52  ;;  %v506_v59 = vld [vmem:[%s1946_s13 + $0x148] sm:$0xff]  ;;  %v507_v61 = vld [vmem:[%s1946_s13 + $0x150] sm:$0xff]  ;;  %v549_v62 = vpack.c.bf16 %v509_v56, %v505_v55  ;;  %v508_v0 = vld [vmem:[%s1946_s13 + $0x158] sm:$0xff] }
  0x91   : > { %v510_v60 = vld [vmem:[%s1946_s13 + $0x168] sm:$0xff]  ;;  %v511_v63 = vld [vmem:[%s1946_s13 + $0x170] sm:$0xff]  ;;  %v512_v1 = vld [vmem:[%s1946_s13 + $0x178] sm:$0xff] }
  0x92   : > { %722 = vmatpush.bf16.msra.mxu0 %v553_v48  ;;  %771 = vmatpush.bf16.msra.mxu1 %v554_v49  ;;  %v550_v2 = vpack.c.bf16 %v510_v60, %v506_v59  ;;  %v551_v3 = vpack.c.bf16 %v511_v63, %v507_v61  ;;  %v497_v4 = vld [vmem:[%s1946_s13 + $0x100] sm:$0xff]  ;;  %v498_v6 = vld [vmem:[%s1946_s13 + $0x108] sm:$0xff]  ;;  %v552_v7 = vpack.c.bf16 %v512_v1, %v508_v0  ;;  %v499_v9 = vld [vmem:[%s1946_s13 + $0x110] sm:$0xff] }
  0x93   : > { %820 = vmatpush.bf16.msra.mxu2 %v555_v53  ;;  %v501_v5 = vld [vmem:[%s1946_s13 + $0x120] sm:$0xff]  ;;  %v502_v8 = vld [vmem:[%s1946_s13 + $0x128] sm:$0xff]  ;;  %v503_v10 = vld [vmem:[%s1946_s13 + $0x130] sm:$0xff] }
  0x94   : > { %869 = vmatpush.bf16.msra.mxu3 %v556_v58  ;;  %v500_v11 = vld [vmem:[%s1946_s13 + $0x118] sm:$0xff]  ;;  %v545_v13 = vpack.c.bf16 %v501_v5, %v497_v4  ;;  %v546_v14 = vpack.c.bf16 %v502_v8, %v498_v6  ;;  %v547_v15 = vpack.c.bf16 %v503_v10, %v499_v9  ;;  %v489_v16 = vld [vmem:[%s1946_s13 + $0xc0] sm:$0xff]  ;;  %v490_v18 = vld [vmem:[%s1946_s13 + $0xc8] sm:$0xff] }
  0x95   : > { %v504_v12 = vld [vmem:[%s1946_s13 + $0x138] sm:$0xff]  ;;  %v493_v17 = vld [vmem:[%s1946_s13 + $0xe0] sm:$0xff]  ;;  %v494_v20 = vld [vmem:[%s1946_s13 + $0xe8] sm:$0xff] }
  0x96   : > { %723 = vmatpush.bf16.msra.mxu0 %v549_v62  ;;  %772 = vmatpush.bf16.msra.mxu1 %v550_v2  ;;  %v548_v19 = vpack.c.bf16 %v504_v12, %v500_v11  ;;  %v491_v21 = vld [vmem:[%s1946_s13 + $0xd0] sm:$0xff]  ;;  %v492_v23 = vld [vmem:[%s1946_s13 + $0xd8] sm:$0xff]  ;;  %v541_v25 = vpack.c.bf16 %v493_v17, %v489_v16  ;;  %v542_v26 = vpack.c.bf16 %v494_v20, %v490_v18  ;;  %v481_v28 = vld [vmem:[%s1946_s13 + $0x80] sm:$0xff] }
  0x97   : > { %821 = vmatpush.bf16.msra.mxu2 %v551_v3  ;;  %v495_v22 = vld [vmem:[%s1946_s13 + $0xf0] sm:$0xff]  ;;  %v496_v24 = vld [vmem:[%s1946_s13 + $0xf8] sm:$0xff]  ;;  %v485_v29 = vld [vmem:[%s1946_s13 + $0xa0] sm:$0xff] }
  0x98   : > { %870 = vmatpush.bf16.msra.mxu3 %v552_v7  ;;  %v543_v27 = vpack.c.bf16 %v495_v22, %v491_v21  ;;  %v482_v30 = vld [vmem:[%s1946_s13 + $0x88] sm:$0xff]  ;;  %v544_v31 = vpack.c.bf16 %v496_v24, %v492_v23  ;;  %v483_v33 = vld [vmem:[%s1946_s13 + $0x90] sm:$0xff]  ;;  %v484_v35 = vld [vmem:[%s1946_s13 + $0x98] sm:$0xff]  ;;  %v537_v37 = vpack.c.bf16 %v485_v29, %v481_v28 }
  0x99   : > { %v486_v32 = vld [vmem:[%s1946_s13 + $0xa8] sm:$0xff]  ;;  %v487_v34 = vld [vmem:[%s1946_s13 + $0xb0] sm:$0xff]  ;;  %v488_v36 = vld [vmem:[%s1946_s13 + $0xb8] sm:$0xff] }
  0x9a   : > { %724 = vmatpush.bf16.msra.mxu0 %v545_v13  ;;  %773 = vmatpush.bf16.msra.mxu1 %v546_v14  ;;  %v473_v38 = vld [vmem:[%s1946_s13 + $0x40] sm:$0xff]  ;;  %v538_v39 = vpack.c.bf16 %v486_v32, %v482_v30  ;;  %v539_v40 = vpack.c.bf16 %v487_v34, %v483_v33  ;;  %v474_v42 = vld [vmem:[%s1946_s13 + $0x48] sm:$0xff]  ;;  %v540_v44 = vpack.c.bf16 %v488_v36, %v484_v35  ;;  %v475_v45 = vld [vmem:[%s1946_s13 + $0x50] sm:$0xff] }
  0x9b   : > { %822 = vmatpush.bf16.msra.mxu2 %v547_v15  ;;  %v477_v41 = vld [vmem:[%s1946_s13 + $0x60] sm:$0xff]  ;;  %v478_v43 = vld [vmem:[%s1946_s13 + $0x68] sm:$0xff]  ;;  %v479_v46 = vld [vmem:[%s1946_s13 + $0x70] sm:$0xff] }
  0x9c   : > { %871 = vmatpush.bf16.msra.mxu3 %v548_v19  ;;  %v917_v47 = vld [vmem:[%s2348_s3] sm:$0xff]  ;;  %v476_v48 = vld [vmem:[%s1946_s13 + $0x58] sm:$0xff]  ;;  %v919_v50 = vld [vmem:[%s2348_s3 + $0x10] sm:$0xff]  ;;  %v533_v51 = vpack.c.bf16 %v477_v41, %v473_v38  ;;  %v534_v52 = vpack.c.bf16 %v478_v43, %v474_v42  ;;  %v535_v53 = vpack.c.bf16 %v479_v46, %v475_v45 }
  0x9d   : > { %v480_v49 = vld [vmem:[%s1946_s13 + $0x78] sm:$0xff]  ;;  %935 = vperm.xlu0 %1574, %v917_v47   ;;  %945 = vperm.xlu1 %1575, %v919_v50   ;;  %v465_v54 = vld [vmem:[%s1946_s13] sm:$0xff]  ;;  %v466_v56 = vld [vmem:[%s1946_s13 + $0x8] sm:$0xff] }
  0x9e   : > { %725 = vmatpush.bf16.msra.mxu0 %v541_v25  ;;  %774 = vmatpush.bf16.msra.mxu1 %v542_v26  ;;  %v469_v55 = vld [vmem:[%s1946_s13 + $0x20] sm:$0xff]  ;;  %v536_v57 = vpack.c.bf16 %v480_v49, %v476_v48  ;;  %v470_v58 = vld [vmem:[%s1946_s13 + $0x28] sm:$0xff]  ;;  %v467_v59 = vld [vmem:[%s1946_s13 + $0x10] sm:$0xff] }
  0x9f   : > { %823 = vmatpush.bf16.msra.mxu2 %v543_v27  ;;  %v471_v60 = vld [vmem:[%s1946_s13 + $0x30] sm:$0xff]  ;;  %v468_v61 = vld [vmem:[%s1946_s13 + $0x18] sm:$0xff]  ;;  %v529_v63 = vpack.c.bf16 %v469_v55, %v465_v54  ;;  %v918_v0 = vld [vmem:[%s2348_s3 + $0x8] sm:$0xff]  ;;  %v530_v1 = vpack.c.bf16 %v470_v58, %v466_v56 }
  0xa0   : > { %872 = vmatpush.bf16.msra.mxu3 %v544_v31  ;;  %v472_v62 = vld [vmem:[%s1946_s13 + $0x38] sm:$0xff]  ;;  %v531_v2 = vpack.c.bf16 %v471_v60, %v467_v59  ;;  %v1509_v4 = vld [vmem:[%s2347_s2] sm:$0xff]  ;;  %v1510_v6 = vld [vmem:[%s2347_s2 + $0x8] sm:$0xff]  ;;  %s1506_s13 = sshll.u32 (%p1711_p6), %s1214_s26, 3 }
  0xa1   : > { %v532_v3 = vpack.c.bf16 %v472_v62, %v468_v61  ;;  %v920_v5 = vld [vmem:[%s2348_s3 + $0x18] sm:$0xff]  ;;  %v1511_v7 = vld [vmem:[%s2347_s2 + $0x10] sm:$0xff]  ;;  %v921_v9 = vld [vmem:[%s2348_s3 + $0x20] sm:$0xff]  ;;  %s2196_s24 = scalar_lea.vmem (%p1711_p6), %s2349_s4, %s1506_s13 }
  0xa2   : > { %726 = vmatpush.bf16.msra.mxu0 %v537_v37  ;;  %775 = vmatpush.bf16.msra.mxu1 %v538_v39  ;;  %v923_v8 = vld [vmem:[%s2348_s3 + $0x30] sm:$0xff]  ;;  %v924_v10 = vld [vmem:[%s2348_s3 + $0x38] sm:$0xff]  ;;  %v922_v11 = vld [vmem:[%s2348_s3 + $0x28] sm:$0xff] }
  0xa3   : > { %824 = vmatpush.bf16.msra.mxu2 %v539_v40  ;;  %955 = vperm.xlu2 %1576, %v921_v9   ;;  %v1512_v12 = vld [vmem:[%s2347_s2 + $0x18] sm:$0xff]  ;;  %v926_v13 = vld [vmem:[%s2348_s3 + $0x48] sm:$0xff]  ;;  %v929_v14 = vld [vmem:[%s2348_s3 + $0x60] sm:$0xff] }
  0xa4   : > { %873 = vmatpush.bf16.msra.mxu3 %v540_v44  ;;  %v1513_v15 = vld [vmem:[%s2347_s2 + $0x20] sm:$0xff]  ;;  %v927_v16 = vld [vmem:[%s2348_s3 + $0x50] sm:$0xff]  ;;  %v932_v17 = vld [vmem:[%s2348_s3 + $0x78] sm:$0xff] }
  0xa5   : > { %940 = vperm.xlu0 %1574, %v918_v0   ;;  %950 = vperm.xlu1 %1575, %v920_v5   ;;  %v925_v18 = vld [vmem:[%s2348_s3 + $0x40] sm:$0xff]  ;;  %v930_v19 = vld [vmem:[%s2348_s3 + $0x68] sm:$0xff]  ;;  %v928_v21 = vld [vmem:[%s2348_s3 + $0x58] sm:$0xff] }
  0xa6   : > { %727 = vmatpush.bf16.msra.mxu0 %v533_v51  ;;  %776 = vmatpush.bf16.msra.mxu1 %v534_v52  ;;  %v1514_v20 = vld [vmem:[%s2347_s2 + $0x28] sm:$0xff]  ;;  %v1515_v22 = vld [vmem:[%s2347_s2 + $0x30] sm:$0xff]  ;;  %v1516_v24 = vld [vmem:[%s2347_s2 + $0x38] sm:$0xff] }
  0xa7   : > { %825 = vmatpush.bf16.msra.mxu2 %v535_v53  ;;  %v931_v23 = vld [vmem:[%s2348_s3 + $0x70] sm:$0xff]  ;;  %v577_v25 = vld [vmem:[%s2086_s10] sm:$0xff]  ;;  %v578_v32 = vld [vmem:[%s2086_s10 + $0x8] sm:$0xff] }
  0xa8   : > { %874 = vmatpush.bf16.msra.mxu3 %v536_v57  ;;  %v609_v26 = vunpack.c.l.bf16 %v577_v25  ;;  %v610_v28 = vunpack.c.h.bf16 %v577_v25  ;;  %v579_v34 = vld [vmem:[%s2086_s10 + $0x10] sm:$0xff]  ;;  %v611_v37 = vunpack.c.l.bf16 %v578_v32  ;;  %v612_v39 = vunpack.c.h.bf16 %v578_v32  ;;  %v580_v51 = vld [vmem:[%s2086_s10 + $0x18] sm:$0xff]  ;;  %v581_v54 = vld [vmem:[%s2086_s10 + $0x20] sm:$0xff] }
  0xa9   : > { %v613_v40 = vunpack.c.l.bf16 %v579_v34  ;;  %v614_v42 = vunpack.c.h.bf16 %v579_v34  ;;  %v615_v59 = vunpack.c.l.bf16 %v580_v51  ;;  %v616_v62 = vunpack.c.h.bf16 %v580_v51 }
  0xaa   : > { %728 = vmatpush.bf16.msra.mxu0 %v529_v63  ;;  %777 = vmatpush.bf16.msra.mxu1 %v530_v1  ;;  %v617_v63 = vunpack.c.l.bf16 %v581_v54 }
  0xab   : > { %826 = vmatpush.bf16.msra.mxu2 %v531_v2  ;;  %960 = vperm.xlu2 %1576, %v922_v11   ;;  %v618_v2 = vunpack.c.h.bf16 %v581_v54 }
  0xac   : > { %875 = vmatpush.bf16.msra.mxu3 %v532_v3 }
  0xad   : > { %729 = vmatmul.bf16.vlgmr.msra.gmra.mxu0 %v1509_v4  ;;  %778 = vmatmul.bf16.vlgmr.msra.gmra.mxu1 %v1509_v4 }
  0xae   : > { %827 = vmatmul.bf16.vlgmr.msra.gmra.mxu2 %v1509_v4  ;;  %965 = vperm.xlu0 %1574, %v923_v8  }
  0xaf   : > { %876 = vmatmul.bf16.vlgmr.msra.gmra.mxu3 %v1509_v4  ;;  %970 = vperm.xlu1 %1575, %v924_v10   ;;  %v582_v10 = vld [vmem:[%s2086_s10 + $0x28] sm:$0xff] }
  0xb3   : > { %975 = vperm.xlu2 %1576, %v925_v18   ;;  %v619_v18 = vunpack.c.l.bf16 %v582_v10 }
  0xb6   : > { %980 = vperm.xlu0 %1574, %v926_v13   ;;  %v583_v13 = vld [vmem:[%s2086_s10 + $0x30] sm:$0xff] }
  0xb7   : > { %985 = vperm.xlu1 %1575, %v927_v16  }
  0xbb   : > { %990 = vperm.xlu2 %1576, %v928_v21   ;;  %v620_v21 = vunpack.c.h.bf16 %v582_v10 }
  0xbd   : > { %734 = vmatmul.bf16.gmra.mxu0 %v1510_v6  ;;  %783 = vmatmul.bf16.gmra.mxu1 %v1510_v6 }
  0xbe   : > { %832 = vmatmul.bf16.gmra.mxu2 %v1510_v6  ;;  %995 = vperm.xlu0 %1574, %v929_v14  }
  0xbf   : > { %881 = vmatmul.bf16.gmra.mxu3 %v1510_v6  ;;  %1000 = vperm.xlu1 %1575, %v930_v19  }
  0xc3   : > { %1005 = vperm.xlu2 %1576, %v931_v23  }
  0xc6   : > { %1010 = vperm.xlu0 %1574, %v932_v17  }
  0xcd   : > { %739 = vmatmul.bf16.gmra.mxu0 %v1511_v7  ;;  %788 = vmatmul.bf16.gmra.mxu1 %v1511_v7 }
  0xce   : > { %837 = vmatmul.bf16.gmra.mxu2 %v1511_v7 }
  0xcf   : > { %886 = vmatmul.bf16.gmra.mxu3 %v1511_v7 }
  0xdd   : > { %744 = vmatmul.bf16.gmra.mxu0 %v1512_v12  ;;  %793 = vmatmul.bf16.gmra.mxu1 %v1512_v12 }
  0xde   : > { %842 = vmatmul.bf16.gmra.mxu2 %v1512_v12 }
  0xdf   : > { %891 = vmatmul.bf16.gmra.mxu3 %v1512_v12 }
  0xed   : > { %749 = vmatmul.bf16.gmra.mxu0 %v1513_v15  ;;  %798 = vmatmul.bf16.gmra.mxu1 %v1513_v15 }
  0xee   : > { %847 = vmatmul.bf16.gmra.mxu2 %v1513_v15 }
  0xef   : > { %896 = vmatmul.bf16.gmra.mxu3 %v1513_v15 }
  0xfd   : > { %754 = vmatmul.bf16.gmra.mxu0 %v1514_v20  ;;  %803 = vmatmul.bf16.gmra.mxu1 %v1514_v20 }
  0xfe   : > { %852 = vmatmul.bf16.gmra.mxu2 %v1514_v20 }
  0xff   : > { %901 = vmatmul.bf16.gmra.mxu3 %v1514_v20 }
 0x10d   : > { %759 = vmatmul.bf16.gmra.mxu0 %v1515_v22  ;;  %808 = vmatmul.bf16.gmra.mxu1 %v1515_v22 }
 0x10e   : > { %857 = vmatmul.bf16.gmra.mxu2 %v1515_v22 }
 0x10f   : > { %906 = vmatmul.bf16.gmra.mxu3 %v1515_v22  ;;  %v936_v27 = vpop.permute.xlu0 %935  ;;  %v946_v0 = vpop.permute.xlu1 %945  ;;  %v621_v22 = vunpack.c.l.bf16 %v583_v13 }
 0x117   : > { %v941_v44 = vpop.permute.xlu0 %940 }
 0x11d   : > { %764 = vmatmul.bf16.gmra.mxu0 %v1516_v24  ;;  %813 = vmatmul.bf16.gmra.mxu1 %v1516_v24 }
 0x11e   : > { %862 = vmatmul.bf16.gmra.mxu2 %v1516_v24 }
 0x11f   : > { %911 = vmatmul.bf16.gmra.mxu3 %v1516_v24  ;;  %v622_v24 = vunpack.c.h.bf16 %v583_v13 }
 0x12a   : > { %v730_v29 = vpop.f32.mrf.mxu0  ;;  %v779_v31 = vpop.f32.mrf.mxu1 }
 0x12b   : > { %v731_v30 = vadd.f32 %v730_v29, %v609_v26  ;;  %v780_v33 = vadd.f32 %v779_v31, %v610_v28  ;;  %v951_v26 = vpop.permute.xlu1 %950 }
 0x12d   : > { %v1013_v35 = vadd.f32 %v936_v27, %v731_v30  ;;  %v1014_v36 = vadd.f32 %v936_v27, %v780_v33  ;;  %v584_v33 = vld [vmem:[%s2086_s10 + $0x38] sm:$0xff] }
 0x12f   : > { %v1077_v38 = vmax.f32 %v1013_v35, 0.0  ;;  %v1078_v41 = vmax.f32 %v1014_v36, 0.0  ;;  %v585_v36 = vld [vmem:[%s2086_s10 + $0x40] sm:$0xff] }
 0x131   : > { %1141 = vst [vmem:[%s2092_s15] sm:$0xff] %v1077_v38  ;;  %v828_v43 = vpop.f32.mrf.mxu2 }
 0x132   : > { %1142 = vst [vmem:[%s2092_s15 + $0x8] sm:$0xff] %v1078_v41  ;;  %v829_v45 = vadd.f32 %v828_v43, %v611_v37  ;;  %v877_v46 = vpop.f32.mrf.mxu3  ;;  %v732_v47 = vpop.f32.mrf.mxu0  ;;  %v623_v41 = vunpack.c.l.bf16 %v584_v33 }
 0x133   : > { %v878_v48 = vadd.f32 %v877_v46, %v612_v39  ;;  %v733_v49 = vadd.f32 %v732_v47, %v613_v40  ;;  %v781_v50 = vpop.f32.mrf.mxu1  ;;  %v956_v46 = vpop.permute.xlu2 %955 }
 0x134   : > { %v1015_v52 = vadd.f32 %v936_v27, %v829_v45  ;;  %v782_v53 = vadd.f32 %v781_v50, %v614_v42  ;;  %v625_v45 = vunpack.c.l.bf16 %v585_v36 }
 0x135   : > { %v1016_v55 = vadd.f32 %v936_v27, %v878_v48  ;;  %v1017_v56 = vadd.f32 %v941_v44, %v733_v49  ;;  %v626_v48 = vunpack.c.h.bf16 %v585_v36 }
 0x136   : > { %v1079_v57 = vmax.f32 %v1015_v52, 0.0  ;;  %v1018_v58 = vadd.f32 %v941_v44, %v782_v53 }
 0x137   : > { %v1080_v60 = vmax.f32 %v1016_v55, 0.0  ;;  %v1081_v61 = vmax.f32 %v1017_v56, 0.0  ;;  %v586_v56 = vld [vmem:[%s2086_s10 + $0x48] sm:$0xff] }
 0x138   : > { %1143 = vst [vmem:[%s2092_s15 + $0x10] sm:$0xff] %v1079_v57  ;;  %v1082_v1 = vmax.f32 %v1018_v58, 0.0 }
 0x139   : > { %1144 = vst [vmem:[%s2092_s15 + $0x18] sm:$0xff] %v1080_v60  ;;  %v830_v3 = vpop.f32.mrf.mxu2 }
 0x13a   : > { %1145 = vst [vmem:[%s2092_s15 + $0x20] sm:$0xff] %v1081_v61  ;;  %v831_v4 = vadd.f32 %v830_v3, %v615_v59  ;;  %v879_v5 = vpop.f32.mrf.mxu3  ;;  %v735_v6 = vpop.f32.mrf.mxu0  ;;  %v587_v59 = vld [vmem:[%s2086_s10 + $0x50] sm:$0xff]  ;;  %v628_v3 = vunpack.c.h.bf16 %v586_v56 }
 0x13b   : > { %1146 = vst [vmem:[%s2092_s15 + $0x28] sm:$0xff] %v1082_v1  ;;  %v880_v7 = vadd.f32 %v879_v5, %v616_v62  ;;  %v736_v8 = vadd.f32 %v735_v6, %v617_v63  ;;  %v784_v9 = vpop.f32.mrf.mxu1  ;;  %v630_v6 = vunpack.c.h.bf16 %v587_v59 }
 0x13c   : > { %v1019_v11 = vadd.f32 %v941_v44, %v831_v4  ;;  %v785_v12 = vadd.f32 %v784_v9, %v618_v2  ;;  %v629_v4 = vunpack.c.l.bf16 %v587_v59 }
 0x13d   : > { %v1020_v14 = vadd.f32 %v941_v44, %v880_v7  ;;  %v1021_v15 = vadd.f32 %v946_v0, %v736_v8  ;;  %v624_v44 = vunpack.c.h.bf16 %v584_v33  ;;  %v961_v8 = vpop.permute.xlu2 %960 }
 0x13e   : > { %v1083_v16 = vmax.f32 %v1019_v11, 0.0  ;;  %v1022_v17 = vadd.f32 %v946_v0, %v785_v12 }
 0x13f   : > { %v1084_v19 = vmax.f32 %v1020_v14, 0.0  ;;  %v1085_v20 = vmax.f32 %v1021_v15, 0.0  ;;  %v588_v15 = vld [vmem:[%s2086_s10 + $0x58] sm:$0xff] }
 0x140   : > { %1147 = vst [vmem:[%s2092_s15 + $0x30] sm:$0xff] %v1083_v16  ;;  %v1086_v23 = vmax.f32 %v1022_v17, 0.0 }
 0x141   : > { %1148 = vst [vmem:[%s2092_s15 + $0x38] sm:$0xff] %v1084_v19  ;;  %v833_v25 = vpop.f32.mrf.mxu2 }
 0x142   : > { %1149 = vst [vmem:[%s2092_s15 + $0x40] sm:$0xff] %v1085_v20  ;;  %v834_v27 = vadd.f32 %v833_v25, %v619_v18  ;;  %v882_v28 = vpop.f32.mrf.mxu3  ;;  %v737_v29 = vpop.f32.mrf.mxu0  ;;  %v589_v18 = vld [vmem:[%s2086_s10 + $0x60] sm:$0xff] }
 0x143   : > { %1150 = vst [vmem:[%s2092_s15 + $0x48] sm:$0xff] %v1086_v23  ;;  %v883_v30 = vadd.f32 %v882_v28, %v620_v21  ;;  %v738_v31 = vadd.f32 %v737_v29, %v621_v22  ;;  %v786_v32 = vpop.f32.mrf.mxu1  ;;  %v631_v23 = vunpack.c.l.bf16 %v588_v15  ;;  %v634_v29 = vunpack.c.h.bf16 %v589_v18 }
 0x144   : > { %v1023_v34 = vadd.f32 %v946_v0, %v834_v27  ;;  %v787_v35 = vadd.f32 %v786_v32, %v622_v24  ;;  %v633_v27 = vunpack.c.l.bf16 %v589_v18 }
 0x145   : > { %v1024_v37 = vadd.f32 %v946_v0, %v883_v30  ;;  %v1025_v38 = vadd.f32 %v951_v26, %v738_v31  ;;  %v627_v0 = vunpack.c.l.bf16 %v586_v56  ;;  %v966_v31 = vpop.permute.xlu0 %965 }
 0x146   : > { %v1087_v39 = vmax.f32 %v1023_v34, 0.0  ;;  %v1026_v40 = vadd.f32 %v951_v26, %v787_v35 }
 0x147   : > { %v1088_v42 = vmax.f32 %v1024_v37, 0.0  ;;  %v1089_v43 = vmax.f32 %v1025_v38, 0.0  ;;  %v590_v38 = vld [vmem:[%s2086_s10 + $0x68] sm:$0xff] }
 0x148   : > { %1151 = vst [vmem:[%s2092_s15 + $0x50] sm:$0xff] %v1087_v39  ;;  %v1090_v47 = vmax.f32 %v1026_v40, 0.0 }
 0x149   : > { %1152 = vst [vmem:[%s2092_s15 + $0x58] sm:$0xff] %v1088_v42  ;;  %v835_v49 = vpop.f32.mrf.mxu2 }
 0x14a   : > { %1153 = vst [vmem:[%s2092_s15 + $0x60] sm:$0xff] %v1089_v43  ;;  %v836_v50 = vadd.f32 %v835_v49, %v623_v41  ;;  %v884_v51 = vpop.f32.mrf.mxu3  ;;  %v740_v52 = vpop.f32.mrf.mxu0  ;;  %v591_v41 = vld [vmem:[%s2086_s10 + $0x70] sm:$0xff] }
 0x14b   : > { %1154 = vst [vmem:[%s2092_s15 + $0x68] sm:$0xff] %v1090_v47  ;;  %v885_v53 = vadd.f32 %v884_v51, %v624_v44  ;;  %v741_v54 = vadd.f32 %v740_v52, %v625_v45  ;;  %v789_v55 = vpop.f32.mrf.mxu1  ;;  %v635_v45 = vunpack.c.l.bf16 %v590_v38  ;;  %v638_v52 = vunpack.c.h.bf16 %v591_v41 }
 0x14c   : > { %v1027_v57 = vadd.f32 %v951_v26, %v836_v50  ;;  %v790_v58 = vadd.f32 %v789_v55, %v626_v48  ;;  %v636_v48 = vunpack.c.h.bf16 %v590_v38  ;;  %v637_v50 = vunpack.c.l.bf16 %v591_v41 }
 0x14d   : > { %v1028_v60 = vadd.f32 %v951_v26, %v885_v53  ;;  %v1029_v61 = vadd.f32 %v956_v46, %v741_v54  ;;  %v632_v26 = vunpack.c.h.bf16 %v588_v15  ;;  %v971_v54 = vpop.permute.xlu1 %970 }
 0x14e   : > { %v1091_v62 = vmax.f32 %v1027_v57, 0.0  ;;  %v1030_v63 = vadd.f32 %v956_v46, %v790_v58 }
 0x14f   : > { %v1092_v1 = vmax.f32 %v1028_v60, 0.0  ;;  %v1093_v2 = vmax.f32 %v1029_v61, 0.0  ;;  %v592_v61 = vld [vmem:[%s2086_s10 + $0x78] sm:$0xff] }
 0x150   : > { %1155 = vst [vmem:[%s2092_s15 + $0x70] sm:$0xff] %v1091_v62  ;;  %v1094_v5 = vmax.f32 %v1030_v63, 0.0 }
 0x151   : > { %1156 = vst [vmem:[%s2092_s15 + $0x78] sm:$0xff] %v1092_v1  ;;  %v838_v7 = vpop.f32.mrf.mxu2 }
 0x152   : > { %1157 = vst [vmem:[%s2092_s15 + $0x80] sm:$0xff] %v1093_v2  ;;  %v839_v9 = vadd.f32 %v838_v7, %v627_v0  ;;  %v887_v10 = vpop.f32.mrf.mxu3  ;;  %v742_v11 = vpop.f32.mrf.mxu0  ;;  %v593_v0 = vld [vmem:[%s2086_s10 + $0x80] sm:$0xff] }
 0x153   : > { %1158 = vst [vmem:[%s2092_s15 + $0x88] sm:$0xff] %v1094_v5  ;;  %v888_v12 = vadd.f32 %v887_v10, %v628_v3  ;;  %v743_v13 = vadd.f32 %v742_v11, %v629_v4  ;;  %v791_v14 = vpop.f32.mrf.mxu1  ;;  %v639_v5 = vunpack.c.l.bf16 %v592_v61  ;;  %v642_v11 = vunpack.c.h.bf16 %v593_v0 }
 0x154   : > { %v1031_v16 = vadd.f32 %v956_v46, %v839_v9  ;;  %v792_v17 = vadd.f32 %v791_v14, %v630_v6  ;;  %v641_v9 = vunpack.c.l.bf16 %v593_v0 }
 0x155   : > { %v1032_v19 = vadd.f32 %v956_v46, %v888_v12  ;;  %v1033_v20 = vadd.f32 %v961_v8, %v743_v13  ;;  %v976_v13 = vpop.permute.xlu2 %975 }
 0x156   : > { %v1095_v21 = vmax.f32 %v1031_v16, 0.0  ;;  %v1034_v22 = vadd.f32 %v961_v8, %v792_v17 }
 0x157   : > { %v1096_v24 = vmax.f32 %v1032_v19, 0.0  ;;  %v1097_v25 = vmax.f32 %v1033_v20, 0.0  ;;  %v594_v20 = vld [vmem:[%s2086_s10 + $0x88] sm:$0xff] }
 0x158   : > { %1159 = vst [vmem:[%s2092_s15 + $0x90] sm:$0xff] %v1095_v21  ;;  %v1098_v28 = vmax.f32 %v1034_v22, 0.0 }
 0x159   : > { %1160 = vst [vmem:[%s2092_s15 + $0x98] sm:$0xff] %v1096_v24  ;;  %v840_v30 = vpop.f32.mrf.mxu2 }
 0x15a   : > { %1161 = vst [vmem:[%s2092_s15 + $0xa0] sm:$0xff] %v1097_v25  ;;  %v841_v32 = vadd.f32 %v840_v30, %v631_v23  ;;  %v889_v33 = vpop.f32.mrf.mxu3  ;;  %v745_v34 = vpop.f32.mrf.mxu0  ;;  %v595_v23 = vld [vmem:[%s2086_s10 + $0x90] sm:$0xff]  ;;  %v644_v30 = vunpack.c.h.bf16 %v594_v20 }
 0x15b   : > { %1162 = vst [vmem:[%s2092_s15 + $0xa8] sm:$0xff] %v1098_v28  ;;  %v890_v35 = vadd.f32 %v889_v33, %v632_v26  ;;  %v746_v36 = vadd.f32 %v745_v34, %v633_v27  ;;  %v794_v37 = vpop.f32.mrf.mxu1  ;;  %v643_v27 = vunpack.c.l.bf16 %v594_v20  ;;  %v646_v34 = vunpack.c.h.bf16 %v595_v23 }
 0x15c   : > { %v1035_v39 = vadd.f32 %v961_v8, %v841_v32  ;;  %v795_v40 = vadd.f32 %v794_v37, %v634_v29  ;;  %v645_v32 = vunpack.c.l.bf16 %v595_v23 }
 0x15d   : > { %v1036_v42 = vadd.f32 %v961_v8, %v890_v35  ;;  %v1037_v43 = vadd.f32 %v966_v31, %v746_v36  ;;  %v640_v8 = vunpack.c.h.bf16 %v592_v61 }
 0x15e   : > { %v1099_v44 = vmax.f32 %v1035_v39, 0.0  ;;  %v1038_v46 = vadd.f32 %v966_v31, %v795_v40 }
 0x15f   : > { %v1100_v47 = vmax.f32 %v1036_v42, 0.0  ;;  %v1101_v49 = vmax.f32 %v1037_v43, 0.0  ;;  %v596_v42 = vld [vmem:[%s2086_s10 + $0x98] sm:$0xff] }
 0x160   : > { %1163 = vst [vmem:[%s2092_s15 + $0xb0] sm:$0xff] %v1099_v44  ;;  %v1102_v51 = vmax.f32 %v1038_v46, 0.0  ;;  %v981_v44 = vpop.permute.xlu0 %980  ;;  %v597_v46 = vld [vmem:[%s2086_s10 + $0xa0] sm:$0xff] }
 0x161   : > { %1164 = vst [vmem:[%s2092_s15 + $0xb8] sm:$0xff] %v1100_v47  ;;  %v843_v53 = vpop.f32.mrf.mxu2 }
 0x162   : > { %v844_v55 = vadd.f32 %v843_v53, %v635_v45  ;;  %v892_v56 = vpop.f32.mrf.mxu3  ;;  %1165 = vst [vmem:[%s2092_s15 + $0xc0] sm:$0xff] %v1101_v49  ;;  %v747_v57 = vpop.f32.mrf.mxu0 }
 0x163   : > { %v893_v58 = vadd.f32 %v892_v56, %v636_v48  ;;  %1166 = vst [vmem:[%s2092_s15 + $0xc8] sm:$0xff] %v1102_v51  ;;  %v748_v59 = vadd.f32 %v747_v57, %v637_v50  ;;  %v796_v60 = vpop.f32.mrf.mxu1  ;;  %v647_v51 = vunpack.c.l.bf16 %v596_v42  ;;  %v650_v57 = vunpack.c.h.bf16 %v597_v46 }
 0x164   : > { %v1039_v62 = vadd.f32 %v966_v31, %v844_v55  ;;  %v797_v63 = vadd.f32 %v796_v60, %v638_v52  ;;  %v649_v55 = vunpack.c.l.bf16 %v597_v46 }
 0x165   : > { %v1040_v1 = vadd.f32 %v966_v31, %v893_v58  ;;  %v1041_v2 = vadd.f32 %v971_v54, %v748_v59  ;;  %v986_v59 = vpop.permute.xlu1 %985 }
 0x166   : > { %v1103_v3 = vmax.f32 %v1039_v62, 0.0  ;;  %v1042_v4 = vadd.f32 %v971_v54, %v797_v63 }
 0x167   : > { %v1104_v6 = vmax.f32 %v1040_v1, 0.0  ;;  %v1105_v7 = vmax.f32 %v1041_v2, 0.0  ;;  %v598_v2 = vld [vmem:[%s2086_s10 + $0xa8] sm:$0xff] }
 0x168   : > { %1167 = vst [vmem:[%s2092_s15 + $0xd0] sm:$0xff] %v1103_v3  ;;  %v1106_v10 = vmax.f32 %v1042_v4, 0.0 }
 0x169   : > { %1168 = vst [vmem:[%s2092_s15 + $0xd8] sm:$0xff] %v1104_v6  ;;  %v845_v12 = vpop.f32.mrf.mxu2 }
 0x16a   : > { %1169 = vst [vmem:[%s2092_s15 + $0xe0] sm:$0xff] %v1105_v7  ;;  %v846_v14 = vadd.f32 %v845_v12, %v639_v5  ;;  %v894_v15 = vpop.f32.mrf.mxu3  ;;  %v750_v16 = vpop.f32.mrf.mxu0  ;;  %v599_v5 = vld [vmem:[%s2086_s10 + $0xb0] sm:$0xff]  ;;  %v652_v12 = vunpack.c.h.bf16 %v598_v2 }
 0x16b   : > { %1170 = vst [vmem:[%s2092_s15 + $0xe8] sm:$0xff] %v1106_v10  ;;  %v895_v17 = vadd.f32 %v894_v15, %v640_v8  ;;  %v751_v18 = vadd.f32 %v750_v16, %v641_v9  ;;  %v799_v19 = vpop.f32.mrf.mxu1  ;;  %v651_v9 = vunpack.c.l.bf16 %v598_v2  ;;  %v654_v16 = vunpack.c.h.bf16 %v599_v5 }
 0x16c   : > { %v1043_v21 = vadd.f32 %v971_v54, %v846_v14  ;;  %v800_v22 = vadd.f32 %v799_v19, %v642_v11  ;;  %v653_v14 = vunpack.c.l.bf16 %v599_v5 }
 0x16d   : > { %v1044_v24 = vadd.f32 %v971_v54, %v895_v17  ;;  %v1045_v25 = vadd.f32 %v976_v13, %v751_v18  ;;  %v648_v54 = vunpack.c.h.bf16 %v596_v42 }
 0x16e   : > { %v1107_v26 = vmax.f32 %v1043_v21, 0.0  ;;  %v1046_v28 = vadd.f32 %v976_v13, %v800_v22 }
 0x16f   : > { %v1108_v29 = vmax.f32 %v1044_v24, 0.0  ;;  %v1109_v31 = vmax.f32 %v1045_v25, 0.0  ;;  %v600_v24 = vld [vmem:[%s2086_s10 + $0xb8] sm:$0xff]  ;;  %v991_v25 = vpop.permute.xlu2 %990 }
 0x170   : > { %1171 = vst [vmem:[%s2092_s15 + $0xf0] sm:$0xff] %v1107_v26  ;;  %v1110_v33 = vmax.f32 %v1046_v28, 0.0  ;;  %v601_v28 = vld [vmem:[%s2086_s10 + $0xc0] sm:$0xff] }
 0x171   : > { %1172 = vst [vmem:[%s2092_s15 + $0xf8] sm:$0xff] %v1108_v29  ;;  %v848_v35 = vpop.f32.mrf.mxu2 }
 0x172   : > { %v849_v36 = vadd.f32 %v848_v35, %v643_v27  ;;  %v897_v37 = vpop.f32.mrf.mxu3  ;;  %1173 = vst [vmem:[%s2092_s15 + $0x100] sm:$0xff] %v1109_v31  ;;  %v752_v38 = vpop.f32.mrf.mxu0 }
 0x173   : > { %v898_v39 = vadd.f32 %v897_v37, %v644_v30  ;;  %1174 = vst [vmem:[%s2092_s15 + $0x108] sm:$0xff] %v1110_v33  ;;  %v753_v40 = vadd.f32 %v752_v38, %v645_v32  ;;  %v801_v41 = vpop.f32.mrf.mxu1  ;;  %v655_v33 = vunpack.c.l.bf16 %v600_v24  ;;  %v657_v37 = vunpack.c.l.bf16 %v601_v28 }
 0x174   : > { %v1047_v43 = vadd.f32 %v976_v13, %v849_v36  ;;  %v802_v45 = vadd.f32 %v801_v41, %v646_v34  ;;  %v656_v36 = vunpack.c.h.bf16 %v600_v24 }
 0x175   : > { %v1048_v47 = vadd.f32 %v976_v13, %v898_v39  ;;  %v1049_v48 = vadd.f32 %v981_v44, %v753_v40  ;;  %v658_v39 = vunpack.c.h.bf16 %v601_v28 }
 0x176   : > { %v1111_v49 = vmax.f32 %v1047_v43, 0.0  ;;  %v1050_v50 = vadd.f32 %v981_v44, %v802_v45 }
 0x177   : > { %v1112_v52 = vmax.f32 %v1048_v47, 0.0  ;;  %v1113_v53 = vmax.f32 %v1049_v48, 0.0  ;;  %v602_v47 = vld [vmem:[%s2086_s10 + $0xc8] sm:$0xff]  ;;  %v996_v48 = vpop.permute.xlu0 %995 }
 0x178   : > { %1175 = vst [vmem:[%s2092_s15 + $0x110] sm:$0xff] %v1111_v49  ;;  %v1114_v56 = vmax.f32 %v1050_v50, 0.0 }
 0x179   : > { %1176 = vst [vmem:[%s2092_s15 + $0x118] sm:$0xff] %v1112_v52  ;;  %v850_v58 = vpop.f32.mrf.mxu2 }
 0x17a   : > { %1177 = vst [vmem:[%s2092_s15 + $0x120] sm:$0xff] %v1113_v53  ;;  %v851_v60 = vadd.f32 %v850_v58, %v647_v51  ;;  %v899_v61 = vpop.f32.mrf.mxu3  ;;  %v755_v62 = vpop.f32.mrf.mxu0  ;;  %v603_v51 = vld [vmem:[%s2086_s10 + $0xd0] sm:$0xff] }
 0x17b   : > { %1178 = vst [vmem:[%s2092_s15 + $0x128] sm:$0xff] %v1114_v56  ;;  %v900_v63 = vadd.f32 %v899_v61, %v648_v54  ;;  %v756_v0 = vadd.f32 %v755_v62, %v649_v55  ;;  %v804_v1 = vpop.f32.mrf.mxu1  ;;  %v659_v56 = vunpack.c.l.bf16 %v602_v47  ;;  %v662_v62 = vunpack.c.h.bf16 %v603_v51 }
 0x17c   : > { %v1051_v3 = vadd.f32 %v981_v44, %v851_v60  ;;  %v805_v4 = vadd.f32 %v804_v1, %v650_v57  ;;  %v661_v60 = vunpack.c.l.bf16 %v603_v51 }
 0x17d   : > { %v1052_v6 = vadd.f32 %v981_v44, %v900_v63  ;;  %v1053_v7 = vadd.f32 %v986_v59, %v756_v0 }
 0x17e   : > { %v1115_v8 = vmax.f32 %v1051_v3, 0.0  ;;  %v1054_v10 = vadd.f32 %v986_v59, %v805_v4 }
 0x17f   : > { %v1116_v11 = vmax.f32 %v1052_v6, 0.0  ;;  %v1117_v13 = vmax.f32 %v1053_v7, 0.0  ;;  %v604_v6 = vld [vmem:[%s2086_s10 + $0xd8] sm:$0xff]  ;;  %v1001_v7 = vpop.permute.xlu1 %1000 }
 0x180   : > { %1179 = vst [vmem:[%s2092_s15 + $0x130] sm:$0xff] %v1115_v8  ;;  %v1118_v15 = vmax.f32 %v1054_v10, 0.0  ;;  %v605_v10 = vld [vmem:[%s2086_s10 + $0xe0] sm:$0xff] }
 0x181   : > { %1180 = vst [vmem:[%s2092_s15 + $0x138] sm:$0xff] %v1116_v11  ;;  %v853_v17 = vpop.f32.mrf.mxu2 }
 0x182   : > { %v854_v18 = vadd.f32 %v853_v17, %v651_v9  ;;  %v902_v19 = vpop.f32.mrf.mxu3  ;;  %1181 = vst [vmem:[%s2092_s15 + $0x140] sm:$0xff] %v1117_v13  ;;  %v757_v20 = vpop.f32.mrf.mxu0 }
 0x183   : > { %v903_v21 = vadd.f32 %v902_v19, %v652_v12  ;;  %1182 = vst [vmem:[%s2092_s15 + $0x148] sm:$0xff] %v1118_v15  ;;  %v758_v22 = vadd.f32 %v757_v20, %v653_v14  ;;  %v806_v23 = vpop.f32.mrf.mxu1  ;;  %v663_v15 = vunpack.c.l.bf16 %v604_v6  ;;  %v665_v19 = vunpack.c.l.bf16 %v605_v10 }
 0x184   : > { %v1055_v26 = vadd.f32 %v986_v59, %v854_v18  ;;  %v807_v27 = vadd.f32 %v806_v23, %v654_v16  ;;  %v664_v18 = vunpack.c.h.bf16 %v604_v6 }
 0x185   : > { %v1056_v29 = vadd.f32 %v986_v59, %v903_v21  ;;  %v1057_v30 = vadd.f32 %v991_v25, %v758_v22  ;;  %v660_v59 = vunpack.c.h.bf16 %v602_v47  ;;  %v666_v21 = vunpack.c.h.bf16 %v605_v10  ;;  %v1231_v10 = vld [vmem:[%s2092_s15 + $0x8] sm:$0xff] (%p1711_p6) }
 0x186   : > { %v1119_v31 = vmax.f32 %v1055_v26, 0.0  ;;  %v1058_v32 = vadd.f32 %v991_v25, %v807_v27  ;;  %1232 = vst [vmem:[%s2196_s24 + $0x8] sm:$0xff] (%p1711_p6), %v1231_v10 }
 0x187   : > { %v1120_v34 = vmax.f32 %v1056_v29, 0.0  ;;  %v1121_v35 = vmax.f32 %v1057_v30, 0.0  ;;  %v606_v29 = vld [vmem:[%s2086_s10 + $0xe8] sm:$0xff]  ;;  %v1006_v30 = vpop.permute.xlu2 %1005 }
 0x188   : > { %1183 = vst [vmem:[%s2092_s15 + $0x150] sm:$0xff] %v1119_v31  ;;  %v1122_v38 = vmax.f32 %v1058_v32, 0.0 }
 0x189   : > { %1184 = vst [vmem:[%s2092_s15 + $0x158] sm:$0xff] %v1120_v34  ;;  %v855_v40 = vpop.f32.mrf.mxu2 }
 0x18a   : > { %1185 = vst [vmem:[%s2092_s15 + $0x160] sm:$0xff] %v1121_v35  ;;  %v856_v41 = vadd.f32 %v855_v40, %v655_v33  ;;  %v904_v42 = vpop.f32.mrf.mxu3  ;;  %v760_v43 = vpop.f32.mrf.mxu0  ;;  %v607_v33 = vld [vmem:[%s2086_s10 + $0xf0] sm:$0xff] }
 0x18b   : > { %1186 = vst [vmem:[%s2092_s15 + $0x168] sm:$0xff] %v1122_v38  ;;  %v905_v44 = vadd.f32 %v904_v42, %v656_v36  ;;  %v761_v45 = vadd.f32 %v760_v43, %v657_v37  ;;  %v809_v46 = vpop.f32.mrf.mxu1  ;;  %v667_v38 = vunpack.c.l.bf16 %v606_v29  ;;  %v669_v42 = vunpack.c.l.bf16 %v607_v33 }
 0x18c   : > { %v1059_v49 = vadd.f32 %v991_v25, %v856_v41  ;;  %v810_v50 = vadd.f32 %v809_v46, %v658_v39  ;;  %v668_v41 = vunpack.c.h.bf16 %v606_v29  ;;  %v1269_v29 = vld [vmem:[%s2092_s15 + $0xa0] sm:$0xff] (%p1711_p6) }
 0x18d   : > { %v1060_v52 = vadd.f32 %v991_v25, %v905_v44  ;;  %v1061_v53 = vadd.f32 %v996_v48, %v761_v45  ;;  %v670_v44 = vunpack.c.h.bf16 %v607_v33  ;;  %1270 = vst [vmem:[%s2196_s24 + $0x140] sm:$0xff] (%p1711_p6), %v1269_v29  ;;  %v1277_v33 = vld [vmem:[%s2092_s15 + $0xc0] sm:$0xff] (%p1711_p6) }
 0x18e   : > { %v1123_v54 = vmax.f32 %v1059_v49, 0.0  ;;  %v1062_v55 = vadd.f32 %v996_v48, %v810_v50  ;;  %1278 = vst [vmem:[%s2196_s24 + $0x180] sm:$0xff] (%p1711_p6), %v1277_v33 }
 0x18f   : > { %v1124_v57 = vmax.f32 %v1060_v52, 0.0  ;;  %v1125_v58 = vmax.f32 %v1061_v53, 0.0  ;;  %v608_v52 = vld [vmem:[%s2086_s10 + $0xf8] sm:$0xff]  ;;  %v1011_v53 = vpop.permute.xlu0 %1010 }
 0x190   : > { %1187 = vst [vmem:[%s2092_s15 + $0x170] sm:$0xff] %v1123_v54  ;;  %v1126_v61 = vmax.f32 %v1062_v55, 0.0 }
 0x191   : > { %1188 = vst [vmem:[%s2092_s15 + $0x178] sm:$0xff] %v1124_v57  ;;  %v858_v63 = vpop.f32.mrf.mxu2 }
 0x192   : > { %1189 = vst [vmem:[%s2092_s15 + $0x180] sm:$0xff] %v1125_v58  ;;  %v859_v0 = vadd.f32 %v858_v63, %v659_v56  ;;  %v907_v1 = vpop.f32.mrf.mxu3  ;;  %v762_v2 = vpop.f32.mrf.mxu0  ;;  %v672_v63 = vunpack.c.h.bf16 %v608_v52 }
 0x193   : > { %1190 = vst [vmem:[%s2092_s15 + $0x188] sm:$0xff] %v1126_v61  ;;  %v908_v3 = vadd.f32 %v907_v1, %v660_v59  ;;  %v763_v4 = vadd.f32 %v762_v2, %v661_v60  ;;  %v811_v5 = vpop.f32.mrf.mxu1  ;;  %v671_v60 = vunpack.c.l.bf16 %v608_v52  ;;  %v1315_v52 = vld [vmem:[%s2092_s15 + $0x158] sm:$0xff] (%p1711_p6) }
 0x194   : > { %v1063_v8 = vadd.f32 %v996_v48, %v859_v0  ;;  %v812_v9 = vadd.f32 %v811_v5, %v662_v62  ;;  %1316 = vst [vmem:[%s2196_s24 + $0x298] sm:$0xff] (%p1711_p6), %v1315_v52 }
 0x195   : > { %v1064_v11 = vadd.f32 %v996_v48, %v908_v3  ;;  %v1065_v12 = vadd.f32 %v1001_v7, %v763_v4 }
 0x196   : > { %v1127_v13 = vmax.f32 %v1063_v8, 0.0  ;;  %v1066_v14 = vadd.f32 %v1001_v7, %v812_v9  ;;  %v1229_v9 = vld [vmem:[%s2092_s15] sm:$0xff] (%p1711_p6) }
 0x197   : > { %v1128_v16 = vmax.f32 %v1064_v11, 0.0  ;;  %v1129_v17 = vmax.f32 %v1065_v12, 0.0  ;;  %v1233_v11 = vld [vmem:[%s2092_s15 + $0x10] sm:$0xff] (%p1711_p6)  ;;  %1230 = vst [vmem:[%s2196_s24] sm:$0xff] (%p1711_p6), %v1229_v9  ;;  %v1235_v12 = vld [vmem:[%s2092_s15 + $0x18] sm:$0xff] (%p1711_p6) }
 0x198   : > { %1191 = vst [vmem:[%s2092_s15 + $0x190] sm:$0xff] %v1127_v13  ;;  %v1130_v20 = vmax.f32 %v1066_v14, 0.0  ;;  %v1237_v13 = vld [vmem:[%s2092_s15 + $0x20] sm:$0xff] (%p1711_p6)  ;;  %v1239_v14 = vld [vmem:[%s2092_s15 + $0x28] sm:$0xff] (%p1711_p6) }
 0x199   : > { %1192 = vst [vmem:[%s2092_s15 + $0x198] sm:$0xff] %v1128_v16  ;;  %v860_v22 = vpop.f32.mrf.mxu2  ;;  %v1243_v16 = vld [vmem:[%s2092_s15 + $0x38] sm:$0xff] (%p1711_p6) }
 0x19a   : > { %1193 = vst [vmem:[%s2092_s15 + $0x1a0] sm:$0xff] %v1129_v17  ;;  %v861_v23 = vadd.f32 %v860_v22, %v663_v15  ;;  %v909_v24 = vpop.f32.mrf.mxu3  ;;  %v765_v25 = vpop.f32.mrf.mxu0  ;;  %v1241_v15 = vld [vmem:[%s2092_s15 + $0x30] sm:$0xff] (%p1711_p6)  ;;  %v1245_v17 = vld [vmem:[%s2092_s15 + $0x40] sm:$0xff] (%p1711_p6)  ;;  %v1255_v22 = vld [vmem:[%s2092_s15 + $0x68] sm:$0xff] (%p1711_p6) }
 0x19b   : > { %1194 = vst [vmem:[%s2092_s15 + $0x1a8] sm:$0xff] %v1130_v20  ;;  %v910_v26 = vadd.f32 %v909_v24, %v664_v18  ;;  %v766_v27 = vadd.f32 %v765_v25, %v665_v19  ;;  %v814_v28 = vpop.f32.mrf.mxu1  ;;  %v1247_v18 = vld [vmem:[%s2092_s15 + $0x48] sm:$0xff] (%p1711_p6)  ;;  %v1249_v19 = vld [vmem:[%s2092_s15 + $0x50] sm:$0xff] (%p1711_p6)  ;;  %v1251_v20 = vld [vmem:[%s2092_s15 + $0x58] sm:$0xff] (%p1711_p6) }
 0x19c   : > { %v1067_v31 = vadd.f32 %v1001_v7, %v861_v23  ;;  %v815_v32 = vadd.f32 %v814_v28, %v666_v21  ;;  %1234 = vst [vmem:[%s2196_s24 + $0x10] sm:$0xff] (%p1711_p6), %v1233_v11  ;;  %v1253_v21 = vld [vmem:[%s2092_s15 + $0x60] sm:$0xff] (%p1711_p6)  ;;  %v1257_v23 = vld [vmem:[%s2092_s15 + $0x70] sm:$0xff] (%p1711_p6)  ;;  %v1259_v24 = vld [vmem:[%s2092_s15 + $0x78] sm:$0xff] (%p1711_p6) }
 0x19d   : > { %v1068_v34 = vadd.f32 %v1001_v7, %v910_v26  ;;  %v1069_v35 = vadd.f32 %v1006_v30, %v766_v27  ;;  %1236 = vst [vmem:[%s2196_s24 + $0x18] sm:$0xff] (%p1711_p6), %v1235_v12  ;;  %v1261_v25 = vld [vmem:[%s2092_s15 + $0x80] sm:$0xff] (%p1711_p6)  ;;  %v1263_v26 = vld [vmem:[%s2092_s15 + $0x88] sm:$0xff] (%p1711_p6)  ;;  %v1265_v27 = vld [vmem:[%s2092_s15 + $0x90] sm:$0xff] (%p1711_p6) }
 0x19e   : > { %v1131_v36 = vmax.f32 %v1067_v31, 0.0  ;;  %v1070_v37 = vadd.f32 %v1006_v30, %v815_v32  ;;  %1238 = vst [vmem:[%s2196_s24 + $0x40] sm:$0xff] (%p1711_p6), %v1237_v13  ;;  %v1267_v28 = vld [vmem:[%s2092_s15 + $0x98] sm:$0xff] (%p1711_p6)  ;;  %v1273_v31 = vld [vmem:[%s2092_s15 + $0xb0] sm:$0xff] (%p1711_p6) }
 0x19f   : > { %v1132_v39 = vmax.f32 %v1068_v34, 0.0  ;;  %v1133_v40 = vmax.f32 %v1069_v35, 0.0  ;;  %1240 = vst [vmem:[%s2196_s24 + $0x48] sm:$0xff] (%p1711_p6), %v1239_v14  ;;  %v1275_v32 = vld [vmem:[%s2092_s15 + $0xb8] sm:$0xff] (%p1711_p6)  ;;  %v1279_v34 = vld [vmem:[%s2092_s15 + $0xc8] sm:$0xff] (%p1711_p6)  ;;  %v1281_v35 = vld [vmem:[%s2092_s15 + $0xd0] sm:$0xff] (%p1711_p6) }
 0x1a0   : > { %1195 = vst [vmem:[%s2092_s15 + $0x1b0] sm:$0xff] %v1131_v36  ;;  %v1134_v43 = vmax.f32 %v1070_v37, 0.0  ;;  %v1283_v36 = vld [vmem:[%s2092_s15 + $0xd8] sm:$0xff] (%p1711_p6)  ;;  %v1285_v37 = vld [vmem:[%s2092_s15 + $0xe0] sm:$0xff] (%p1711_p6) }
 0x1a1   : > { %1196 = vst [vmem:[%s2092_s15 + $0x1b8] sm:$0xff] %v1132_v39  ;;  %v863_v45 = vpop.f32.mrf.mxu2  ;;  %v1289_v39 = vld [vmem:[%s2092_s15 + $0xf0] sm:$0xff] (%p1711_p6) }
 0x1a2   : > { %1197 = vst [vmem:[%s2092_s15 + $0x1c0] sm:$0xff] %v1133_v40  ;;  %v864_v46 = vadd.f32 %v863_v45, %v667_v38  ;;  %v912_v47 = vpop.f32.mrf.mxu3  ;;  %v767_v48 = vpop.f32.mrf.mxu0  ;;  %v1287_v38 = vld [vmem:[%s2092_s15 + $0xe8] sm:$0xff] (%p1711_p6)  ;;  %v1291_v40 = vld [vmem:[%s2092_s15 + $0xf8] sm:$0xff] (%p1711_p6)  ;;  %v1301_v45 = vld [vmem:[%s2092_s15 + $0x120] sm:$0xff] (%p1711_p6) }
 0x1a3   : > { %1198 = vst [vmem:[%s2092_s15 + $0x1c8] sm:$0xff] %v1134_v43  ;;  %v913_v49 = vadd.f32 %v912_v47, %v668_v41  ;;  %v768_v50 = vadd.f32 %v767_v48, %v669_v42  ;;  %v816_v51 = vpop.f32.mrf.mxu1  ;;  %v1293_v41 = vld [vmem:[%s2092_s15 + $0x100] sm:$0xff] (%p1711_p6)  ;;  %v1295_v42 = vld [vmem:[%s2092_s15 + $0x108] sm:$0xff] (%p1711_p6)  ;;  %v1297_v43 = vld [vmem:[%s2092_s15 + $0x110] sm:$0xff] (%p1711_p6) }
 0x1a4   : > { %v1071_v54 = vadd.f32 %v1006_v30, %v864_v46  ;;  %v817_v55 = vadd.f32 %v816_v51, %v670_v44  ;;  %1242 = vst [vmem:[%s2196_s24 + $0x50] sm:$0xff] (%p1711_p6), %v1241_v15  ;;  %v1299_v44 = vld [vmem:[%s2092_s15 + $0x118] sm:$0xff] (%p1711_p6)  ;;  %v1303_v46 = vld [vmem:[%s2092_s15 + $0x128] sm:$0xff] (%p1711_p6)  ;;  %v1305_v47 = vld [vmem:[%s2092_s15 + $0x130] sm:$0xff] (%p1711_p6) }
 0x1a5   : > { %v1072_v56 = vadd.f32 %v1006_v30, %v913_v49  ;;  %v1073_v57 = vadd.f32 %v1011_v53, %v768_v50  ;;  %1244 = vst [vmem:[%s2196_s24 + $0x58] sm:$0xff] (%p1711_p6), %v1243_v16  ;;  %v1271_v30 = vld [vmem:[%s2092_s15 + $0xa8] sm:$0xff] (%p1711_p6)  ;;  %v1307_v48 = vld [vmem:[%s2092_s15 + $0x138] sm:$0xff] (%p1711_p6)  ;;  %v1309_v49 = vld [vmem:[%s2092_s15 + $0x140] sm:$0xff] (%p1711_p6) }
 0x1a6   : > { %v1135_v58 = vmax.f32 %v1071_v54, 0.0  ;;  %v1074_v59 = vadd.f32 %v1011_v53, %v817_v55  ;;  %1246 = vst [vmem:[%s2196_s24 + $0x80] sm:$0xff] (%p1711_p6), %v1245_v17  ;;  %v1311_v50 = vld [vmem:[%s2092_s15 + $0x148] sm:$0xff] (%p1711_p6)  ;;  %v1313_v51 = vld [vmem:[%s2092_s15 + $0x150] sm:$0xff] (%p1711_p6) }
 0x1a7   : > { %v1136_v61 = vmax.f32 %v1072_v56, 0.0  ;;  %v1137_v62 = vmax.f32 %v1073_v57, 0.0  ;;  %1248 = vst [vmem:[%s2196_s24 + $0x88] sm:$0xff] (%p1711_p6), %v1247_v18  ;;  %v1319_v54 = vld [vmem:[%s2092_s15 + $0x168] sm:$0xff] (%p1711_p6)  ;;  %v1321_v55 = vld [vmem:[%s2092_s15 + $0x170] sm:$0xff] (%p1711_p6)  ;;  %v1323_v56 = vld [vmem:[%s2092_s15 + $0x178] sm:$0xff] (%p1711_p6) }
 0x1a8   : > { %1199 = vst [vmem:[%s2092_s15 + $0x1d0] sm:$0xff] %v1135_v58  ;;  %v1138_v0 = vmax.f32 %v1074_v59, 0.0  ;;  %v1325_v57 = vld [vmem:[%s2092_s15 + $0x180] sm:$0xff] (%p1711_p6)  ;;  %v1327_v58 = vld [vmem:[%s2092_s15 + $0x188] sm:$0xff] (%p1711_p6)  ;;  %v1329_v59 = vld [vmem:[%s2092_s15 + $0x190] sm:$0xff] (%p1711_p6) }
 0x1a9   : > { %1200 = vst [vmem:[%s2092_s15 + $0x1d8] sm:$0xff] %v1136_v61  ;;  %v865_v1 = vpop.f32.mrf.mxu2  ;;  %v1333_v61 = vld [vmem:[%s2092_s15 + $0x1a0] sm:$0xff] (%p1711_p6) }
 0x1aa   : > { %1201 = vst [vmem:[%s2092_s15 + $0x1e0] sm:$0xff] %v1137_v62  ;;  %v866_v2 = vadd.f32 %v865_v1, %v671_v60  ;;  %v914_v3 = vpop.f32.mrf.mxu3  ;;  %v1331_v60 = vld [vmem:[%s2092_s15 + $0x198] sm:$0xff] (%p1711_p6)  ;;  %v1335_v62 = vld [vmem:[%s2092_s15 + $0x1a8] sm:$0xff] (%p1711_p6)  ;;  %v1341_v1 = vld [vmem:[%s2092_s15 + $0x1c0] sm:$0xff] (%p1711_p6) }
 0x1ab   : > { %1202 = vst [vmem:[%s2092_s15 + $0x1e8] sm:$0xff] %v1138_v0  ;;  %v915_v4 = vadd.f32 %v914_v3, %v672_v63  ;;  %v1337_v63 = vld [vmem:[%s2092_s15 + $0x1b0] sm:$0xff] (%p1711_p6)  ;;  %v1339_v0 = vld [vmem:[%s2092_s15 + $0x1b8] sm:$0xff] (%p1711_p6) }
 0x1ac   : > { %v1075_v5 = vadd.f32 %v1011_v53, %v866_v2  ;;  %1250 = vst [vmem:[%s2196_s24 + $0x90] sm:$0xff] (%p1711_p6), %v1249_v19  ;;  %v1343_v2 = vld [vmem:[%s2092_s15 + $0x1c8] sm:$0xff] (%p1711_p6) }
 0x1ad   : > { %v1076_v6 = vadd.f32 %v1011_v53, %v915_v4  ;;  %1211 = sbr.rel (!%p1711_p6) target bundleno = 481 (0x1e1), region = 86  ;;  %1252 = vst [vmem:[%s2196_s24 + $0x98] sm:$0xff] (%p1711_p6), %v1251_v20  ;;  %v1317_v53 = vld [vmem:[%s2092_s15 + $0x160] sm:$0xff] (%p1711_p6) }
 0x1ae   : > { %v1139_v7 = vmax.f32 %v1075_v5, 0.0  ;;  %1254 = vst [vmem:[%s2196_s24 + $0xc0] sm:$0xff] (%p1711_p6), %v1253_v21 }
 0x1af   : > { %v1140_v8 = vmax.f32 %v1076_v6, 0.0  ;;  %1256 = vst [vmem:[%s2196_s24 + $0xc8] sm:$0xff] (%p1711_p6), %v1255_v22  ;;  %v1345_v3 = vld [vmem:[%s2092_s15 + $0x1d0] sm:$0xff] (%p1711_p6) }
 0x1b0   : > { %1203 = vst [vmem:[%s2092_s15 + $0x1f0] sm:$0xff] %v1139_v7  ;;  %v1347_v4 = vld [vmem:[%s2092_s15 + $0x1d8] sm:$0xff] (%p1711_p6) }
 0x1b1   : > { %1204 = vst [vmem:[%s2092_s15 + $0x1f8] sm:$0xff] %v1140_v8  ;;  %v1349_v5 = vld [vmem:[%s2092_s15 + $0x1e0] sm:$0xff] (%p1711_p6) }
 0x1b2   : > { %1258 = vst [vmem:[%s2196_s24 + $0xd0] sm:$0xff] %v1257_v23  ;;  %v1351_v6 = vld [vmem:[%s2092_s15 + $0x1e8] sm:$0xff] }
 0x1b3   : > { %1260 = vst [vmem:[%s2196_s24 + $0xd8] sm:$0xff] %v1259_v24 }
 0x1b4   : > { %1262 = vst [vmem:[%s2196_s24 + $0x100] sm:$0xff] %v1261_v25 }
 0x1b5   : > { %1264 = vst [vmem:[%s2196_s24 + $0x108] sm:$0xff] %v1263_v26 }
 0x1b6   : > { %1266 = vst [vmem:[%s2196_s24 + $0x110] sm:$0xff] %v1265_v27 }
 0x1b7   : > { %1268 = vst [vmem:[%s2196_s24 + $0x118] sm:$0xff] %v1267_v28  ;;  %v1353_v7 = vld [vmem:[%s2092_s15 + $0x1f0] sm:$0xff] }
 0x1b8   : > { %1272 = vst [vmem:[%s2196_s24 + $0x148] sm:$0xff] %v1271_v30  ;;  %v1355_v8 = vld [vmem:[%s2092_s15 + $0x1f8] sm:$0xff] }
 0x1b9   : > { %1274 = vst [vmem:[%s2196_s24 + $0x150] sm:$0xff] %v1273_v31 }
 0x1ba   : > { %1276 = vst [vmem:[%s2196_s24 + $0x158] sm:$0xff] %v1275_v32 }
 0x1bb   : > { %1280 = vst [vmem:[%s2196_s24 + $0x188] sm:$0xff] %v1279_v34 }
 0x1bc   : > { %1282 = vst [vmem:[%s2196_s24 + $0x190] sm:$0xff] %v1281_v35 }
 0x1bd   : > { %1284 = vst [vmem:[%s2196_s24 + $0x198] sm:$0xff] %v1283_v36 }
 0x1be   : > { %1286 = vst [vmem:[%s2196_s24 + $0x1c0] sm:$0xff] %v1285_v37 }
 0x1bf   : > { %1288 = vst [vmem:[%s2196_s24 + $0x1c8] sm:$0xff] %v1287_v38 }
 0x1c0   : > { %1290 = vst [vmem:[%s2196_s24 + $0x1d0] sm:$0xff] %v1289_v39 }
 0x1c1   : > { %1292 = vst [vmem:[%s2196_s24 + $0x1d8] sm:$0xff] %v1291_v40 }
 0x1c2   : > { %1294 = vst [vmem:[%s2196_s24 + $0x200] sm:$0xff] %v1293_v41 }
 0x1c3   : > { %1296 = vst [vmem:[%s2196_s24 + $0x208] sm:$0xff] %v1295_v42 }
 0x1c4   : > { %1298 = vst [vmem:[%s2196_s24 + $0x210] sm:$0xff] %v1297_v43 }
 0x1c5   : > { %1300 = vst [vmem:[%s2196_s24 + $0x218] sm:$0xff] %v1299_v44 }
 0x1c6   : > { %1302 = vst [vmem:[%s2196_s24 + $0x240] sm:$0xff] %v1301_v45 }
 0x1c7   : > { %1304 = vst [vmem:[%s2196_s24 + $0x248] sm:$0xff] %v1303_v46 }
 0x1c8   : > { %1306 = vst [vmem:[%s2196_s24 + $0x250] sm:$0xff] %v1305_v47 }
 0x1c9   : > { %1308 = vst [vmem:[%s2196_s24 + $0x258] sm:$0xff] %v1307_v48 }
 0x1ca   : > { %1310 = vst [vmem:[%s2196_s24 + $0x280] sm:$0xff] %v1309_v49 }
 0x1cb   : > { %1312 = vst [vmem:[%s2196_s24 + $0x288] sm:$0xff] %v1311_v50 }
 0x1cc   : > { %1314 = vst [vmem:[%s2196_s24 + $0x290] sm:$0xff] %v1313_v51 }
 0x1cd   : > { %1318 = vst [vmem:[%s2196_s24 + $0x2c0] sm:$0xff] %v1317_v53 }
 0x1ce   : > { %1320 = vst [vmem:[%s2196_s24 + $0x2c8] sm:$0xff] %v1319_v54 }
 0x1cf   : > { %1322 = vst [vmem:[%s2196_s24 + $0x2d0] sm:$0xff] %v1321_v55 }
 0x1d0   : > { %1324 = vst [vmem:[%s2196_s24 + $0x2d8] sm:$0xff] %v1323_v56 }
 0x1d1   : > { %1326 = vst [vmem:[%s2196_s24 + $0x300] sm:$0xff] %v1325_v57 }
 0x1d2   : > { %1328 = vst [vmem:[%s2196_s24 + $0x308] sm:$0xff] %v1327_v58 }
 0x1d3   : > { %1330 = vst [vmem:[%s2196_s24 + $0x310] sm:$0xff] %v1329_v59 }
 0x1d4   : > { %1332 = vst [vmem:[%s2196_s24 + $0x318] sm:$0xff] %v1331_v60 }
 0x1d5   : > { %1334 = vst [vmem:[%s2196_s24 + $0x340] sm:$0xff] %v1333_v61 }
 0x1d6   : > { %1336 = vst [vmem:[%s2196_s24 + $0x348] sm:$0xff] %v1335_v62 }
 0x1d7   : > { %1338 = vst [vmem:[%s2196_s24 + $0x350] sm:$0xff] %v1337_v63 }
 0x1d8   : > { %1340 = vst [vmem:[%s2196_s24 + $0x358] sm:$0xff] %v1339_v0 }
 0x1d9   : > { %1342 = vst [vmem:[%s2196_s24 + $0x380] sm:$0xff] %v1341_v1 }
 0x1da   : > { %1344 = vst [vmem:[%s2196_s24 + $0x388] sm:$0xff] %v1343_v2 }
 0x1db   : > { %1346 = vst [vmem:[%s2196_s24 + $0x390] sm:$0xff] %v1345_v3 }
 0x1dc   : > { %1348 = vst [vmem:[%s2196_s24 + $0x398] sm:$0xff] %v1347_v4 }
 0x1dd   : > { %1350 = vst [vmem:[%s2196_s24 + $0x3c0] sm:$0xff] %v1349_v5 }
 0x1de   : > { %1352 = vst [vmem:[%s2196_s24 + $0x3c8] sm:$0xff] %v1351_v6 }
 0x1df   : > { %1354 = vst [vmem:[%s2196_s24 + $0x3d0] sm:$0xff] %v1353_v7 }
 0x1e0   : > { %1356 = vst [vmem:[%s2196_s24 + $0x3d8] sm:$0xff] %v1355_v8 }
 0x1e1 PF: > { %s14_s21 = sadd.s32 1, %s1631_s21   ;;  %s2352_s15 = smov %s1611_s16 }
 0x1e2   : > { %p11_p12 = scmp.ge.s32.totalorder %s14_s21, 6   ;;  %s2353_s16 = smov %s1719_s5 }
 0x1e3   : > { %s2354_s17 = smov %s1623_s19  ;;  %s2355_s18 = smov %s1627_s20 }
 0x1e4   : > { %s2356_s19 = smov %s2359_s22  ;;  %s2357_s20 = smov %s2363_s23 }
 0x1e5   :  { %13 = sbr.rel (!%p11_p12) target bundleno = 4 (0x4), region = 148 }

</bundles_post_ra>
